<compile_context>
chip_gen: v7x
topology: tpu7x:2x2x1
jax: 0.10.0
libtpu: 0.0.40
codegen_flags: <defaults>
</compile_context>

<pallas_src>
import functools

import jax
import jax.numpy as jnp
from jax.experimental import pallas as pl
from jax.experimental.pallas import tpu as pltpu


def _round_up(n, m):
    return ((n + m - 1) // m) * m


# ---------------------------------------------------------------------------
# Kernel
# ---------------------------------------------------------------------------
def _vae_kernel(x_ref, eps_ref,
                w1_ref, b1_ref, w2_ref, b2_ref,
                wmulv_ref, bmulv_ref,
                wd1_ref, bd1_ref, wd2_ref, bd2_ref, wd3_ref, bd3_ref,
                xrec_ref, mulv_ref,
                *, latent_pad):
    """One batch tile of the full VAE forward (6 matmuls, fused mu/logvar head).

    Matmul operands are in the weight dtype (f32 or bf16); accumulation and all
    elementwise math is f32.
    TODO(synk): nn.Dropout layers are treated as identity (inference mode).
    """
    act_dtype = w1_ref.dtype  # MXU operand dtype

    def dense(a, w_ref, b_ref):
        # `a` is already act_dtype; accumulate in f32, add bias in f32.
        return (jnp.dot(a, w_ref[...], preferred_element_type=jnp.float32)
                + b_ref[...].astype(jnp.float32))

    def hidden(a, w_ref, b_ref):
        # ReLU in f32, keep the stored activation in the matmul operand dtype
        # (halves vreg pressure on bf16 paths; one cast per layer either way).
        return jnp.maximum(dense(a, w_ref, b_ref), 0.0).astype(act_dtype)

    x = x_ref[...].astype(act_dtype)

    # ---- shared encoder ----
    h0 = hidden(x, w1_ref, b1_ref)
    h1 = hidden(h0, w2_ref, b2_ref)

    # ---- fused mu / logvar head: one matmul, lane-dense [TB, 2*Lp] ----
    mulv = dense(h1, wmulv_ref, bmulv_ref)
    mu = mulv[:, :latent_pad]       # latent_pad is a multiple of 128 -> aligned split
    lv = mulv[:, latent_pad:]

    # ---- reparameterize: z = mu + eps * exp(logvar / 2)  (f32) ----
    z = mu + eps_ref[...].astype(jnp.float32) * jnp.exp(lv * 0.5)

    # ---- decoder ----
    d1 = hidden(z.astype(act_dtype), wd1_ref, bd1_ref)
    d2 = hidden(d1, wd2_ref, bd2_ref)
    x_rec = jax.nn.sigmoid(dense(d2, wd3_ref, bd3_ref))

    xrec_ref[...] = x_rec.astype(xrec_ref.dtype)
    mulv_ref[...] = mulv.astype(mulv_ref.dtype)


# ---------------------------------------------------------------------------
# One-time parameter preparation (outside the per-call path)
# ---------------------------------------------------------------------------
def prepare_params(params, *, weight_dtype=jnp.float32, lane=None):
    """Pad every feature dim to a lane multiple, fuse the mu/logvar heads into
    one weight, and cast matmul weights to `weight_dtype` (biases stay f32).
    Do this ONCE; reuse the result across forward calls."""
    if lane is None:
        lane = 256 if weight_dtype == jnp.bfloat16 else 128

    input_dim = params["w1"].shape[0]
    hidden_dim_0 = params["w1"].shape[1]
    hidden_dim_1 = params["w2"].shape[1]
    latent_dim = params["wmu"].shape[1]

    Dp = _round_up(input_dim, lane)
    H0p = _round_up(hidden_dim_0, lane)
    H1p = _round_up(hidden_dim_1, lane)
    Lp = _round_up(latent_dim, lane)

    def pad(a, rows, cols):
        r, c = a.shape
        if r == rows and c == cols:
            return a
        return jnp.pad(a, ((0, rows - r), (0, cols - c)))

    w1 = pad(params["w1"], Dp, H0p).astype(weight_dtype)
    b1 = pad(params["b1"], 1, H0p)
    w2 = pad(params["w2"], H0p, H1p).astype(weight_dtype)
    b2 = pad(params["b2"], 1, H1p)
    wmulv = jnp.concatenate([pad(params["wmu"], H1p, Lp),
                             pad(params["wlv"], H1p, Lp)], axis=1).astype(weight_dtype)
    bmulv = jnp.concatenate([pad(params["bmu"], 1, Lp),
                             pad(params["blv"], 1, Lp)], axis=1)
    wd1 = pad(params["wd1"], Lp, H1p).astype(weight_dtype)
    bd1 = pad(params["bd1"], 1, H1p)
    wd2 = pad(params["wd2"], H1p, H0p).astype(weight_dtype)
    bd2 = pad(params["bd2"], 1, H0p)
    wd3 = pad(params["wd3"], H0p, Dp).astype(weight_dtype)
    bd3 = pad(params["bd3"], 1, Dp)

    weights = (w1, b1, w2, b2, wmulv, bmulv, wd1, bd1, wd2, bd2, wd3, bd3)
    return dict(
        weights=weights,
        dims=dict(input_dim=input_dim, latent_dim=latent_dim,
                  hidden_dim_0=hidden_dim_0, hidden_dim_1=hidden_dim_1),
        padded=dict(D=Dp, H0=H0p, H1=H1p, L=Lp),
    )


# ---------------------------------------------------------------------------
# VMEM budget / batch tiling
# ---------------------------------------------------------------------------
def _vmem_budget_bytes():
    """Per-generation VMEM budget (~96 MiB on v5e/v6e, ~48 MiB on v7x)."""
    cap = None
    try:
        cap = getattr(pltpu.get_tpu_info(), "vmem_capacity_bytes", None)
    except Exception:
        cap = None
    if not cap:
        cap = 64 * 1024 * 1024  # conservative default (v7x-sized VMEM)
    return min((int(cap) * 3) // 4, 100 * 1024 * 1024)


def _choose_batch_tile(B, Dp, Lp, H0p, H1p, weight_bytes, budget):
    """Largest multiple-of-8 batch tile (capped at 1024 rows) keeping weights +
    double-buffered I/O tiles + live f32 activations under the VMEM budget.
    Accounts conservatively for double-buffered weights so the fallback
    (default-buffered) path also fits."""
    io_per_row = 2 * (Dp + Lp) + 2 * (Dp + 2 * Lp)              # in/out tiles, 2 bufs
    act_per_row = (H0p + H1p + 2 * Lp + Lp + H1p + H0p + Dp)    # live activations
    per_row_bytes = 4 * (io_per_row + act_per_row)
    avail = budget - 2 * weight_bytes
    tb = min(1024, B, max(8, avail // max(per_row_bytes, 1)))
    tb = max(8, (tb // 8) * 8)
    # Megacore balance (v7x): make sure there are >= 2 grid steps when possible.
    if pl.cdiv(B, tb) == 1 and B >= 16:
        tb = max(8, _round_up(-(-B // 2), 8))
    nb = pl.cdiv(B, tb)
    return int(tb), int(nb)


# ---------------------------------------------------------------------------
# Wrapper
# ---------------------------------------------------------------------------
def vae_forward(x, eps, prepared):
    """x: [B, input_dim], eps: [B, latent_dim]. Returns (x_rec, mu, logvar)."""
    B, input_dim = x.shape
    dims, padded = prepared["dims"], prepared["padded"]
    latent_dim = dims["latent_dim"]
    Dp, H0p, H1p, Lp = padded["D"], padded["H0"], padded["H1"], padded["L"]
    weights = prepared["weights"]
    weight_bytes = sum(int(w.size) * w.dtype.itemsize for w in weights)

    budget = _vmem_budget_bytes()
    TB, nb = _choose_batch_tile(B, Dp, Lp, H0p, H1p, weight_bytes, budget)
    Bp = nb * TB

    # Zero-pad batch and feature dims (pad lanes stay exactly zero end-to-end).
    x_p = jnp.pad(x, ((0, Bp - B), (0, Dp - input_dim)))
    eps_p = jnp.pad(eps.astype(jnp.float32), ((0, Bp - B), (0, Lp - latent_dim)))

    out_shapes = (
        jax.ShapeDtypeStruct((Bp, Dp), jnp.float32),       # x_rec (padded)
        jax.ShapeDtypeStruct((Bp, 2 * Lp), jnp.float32),   # [mu | logvar] (padded)
    )

    flops = 2 * Bp * (Dp * H0p + H0p * H1p + H1p * 2 * Lp
                      + Lp * H1p + H1p * H0p + H0p * Dp)
    transcendentals = Bp * (Lp + Dp)                       # exp + sigmoid
    bytes_accessed = (Bp * (Dp + Lp) * 4 + weight_bytes + Bp * (Dp + 2 * Lp) * 4)

    kernel = functools.partial(_vae_kernel, latent_pad=Lp)

    def run(single_buffer_weights):
        if single_buffer_weights:
            # Weight block index never changes -> single-buffer to free VMEM.
            def wspec(w):
                return pl.BlockSpec(w.shape, lambda i: (0, 0),
                                    pipeline_mode=pl.Buffered(1))
        else:
            def wspec(w):
                return pl.BlockSpec(w.shape, lambda i: (0, 0))
        return pl.pallas_call(
            kernel,
            out_shape=out_shapes,
            grid=(nb,),
            in_specs=[pl.BlockSpec((TB, Dp), lambda i: (i, 0)),
                      pl.BlockSpec((TB, Lp), lambda i: (i, 0))]
                     + [wspec(w) for w in weights],
            out_specs=(pl.BlockSpec((TB, Dp), lambda i: (i, 0)),
                       pl.BlockSpec((TB, 2 * Lp), lambda i: (i, 0))),
            compiler_params=pltpu.CompilerParams(
                dimension_semantics=("parallel",),
                vmem_limit_bytes=budget,
            ),
            cost_estimate=pl.CostEstimate(
                flops=int(flops),
                transcendentals=int(transcendentals),
                bytes_accessed=int(bytes_accessed),
            ),
        )(x_p, eps_p, *weights)

    try:
        x_rec, mulv = run(True)
    except Exception:
        # pipeline_mode / Buffered(1) unsupported on this jax version -> default.
        x_rec, mulv = run(False)

    x_rec = x_rec[:B, :input_dim]
    mu = mulv[:B, :latent_dim]
    lv = mulv[:B, Lp:Lp + latent_dim]
    return x_rec, mu, lv


# ---------------------------------------------------------------------------
# Params / reference
# ---------------------------------------------------------------------------
def init_params(key, input_dim, latent_dim, hidden_dim_0, hidden_dim_1):
    """Deterministic init mimicking PyTorch nn.Linear (uniform +-1/sqrt(fan_in)).
    Weights stored [in, out]; biases [1, out]."""
    def linear(k, fan_in, fan_out):
        kw, kb = jax.random.split(k)
        bound = 1.0 / jnp.sqrt(fan_in)
        w = jax.random.uniform(kw, (fan_in, fan_out), jnp.float32, -bound, bound)
        b = jax.random.uniform(kb, (1, fan_out), jnp.float32, -bound, bound)
        return w, b

    keys = jax.random.split(key, 7)
    w1, b1 = linear(keys[0], input_dim, hidden_dim_0)
    w2, b2 = linear(keys[1], hidden_dim_0, hidden_dim_1)
    wmu, bmu = linear(keys[2], hidden_dim_1, latent_dim)
    wlv, blv = linear(keys[3], hidden_dim_1, latent_dim)
    wd1, bd1 = linear(keys[4], latent_dim, hidden_dim_1)
    wd2, bd2 = linear(keys[5], hidden_dim_1, hidden_dim_0)
    wd3, bd3 = linear(keys[6], hidden_dim_0, input_dim)
    return dict(w1=w1, b1=b1, w2=w2, b2=b2,
                wmu=wmu, bmu=bmu, wlv=wlv, blv=blv,
                wd1=wd1, bd1=bd1, wd2=wd2, bd2=bd2, wd3=wd3, bd3=bd3)


def vae_reference(x, eps, p):
    """Pure-JAX f32 reference."""
    h0 = jnp.maximum(x @ p["w1"] + p["b1"], 0.0)
    h1 = jnp.maximum(h0 @ p["w2"] + p["b2"], 0.0)
    mu = h1 @ p["wmu"] + p["bmu"]
    lv = h1 @ p["wlv"] + p["blv"]
    z = mu + eps * jnp.exp(lv * 0.5)
    d1 = jnp.maximum(z @ p["wd1"] + p["bd1"], 0.0)
    d2 = jnp.maximum(d1 @ p["wd2"] + p["bd2"], 0.0)
    x_ = jax.nn.sigmoid(d2 @ p["wd3"] + p["bd3"])
    return x_, mu, lv


# ---------------------------------------------------------------------------
# Test
# ---------------------------------------------------------------------------
if __name__ == "__main__":
    batch = 8
    input_dim = 32
    hidden_dim_0 = 64
    hidden_dim_1 = 32
    latent_dim = 16

    key = jax.random.PRNGKey(0)
    k_params, k_x, k_eps = jax.random.split(key, 3)

    params = init_params(k_params, input_dim, latent_dim, hidden_dim_0, hidden_dim_1)
    x = jax.random.uniform(k_x, (batch, input_dim), jnp.float32)
    # eps = reparameterization noise (torch.randn_like equivalent), generated
    # outside the kernel for determinism.
    eps = jax.random.normal(k_eps, (batch, latent_dim), jnp.float32)

    xr_ref, mu_ref, lv_ref = vae_reference(x, eps, params)

    # ---- f32 weights (feature dims lane-padded to 128): tight tolerance ----
    prep_f32 = prepare_params(params, weight_dtype=jnp.float32)
    x_rec, z_mean, z_log_var = vae_forward(x, eps, prep_f32)
    jax.block_until_ready((x_rec, z_mean, z_log_var))
    assert jnp.allclose(x_rec, xr_ref, atol=1e-5, rtol=1e-5)
    assert jnp.allclose(z_mean, mu_ref, atol=1e-5, rtol=1e-5)
    assert jnp.allclose(z_log_var, lv_ref, atol=1e-5, rtol=1e-5)

    # ---- bf16 weights + activations (MXU fast path on v5e/v6e/v7x),
    #      f32 accumulation & elementwise math: loose tolerance ----
    prep_bf16 = prepare_params(params, weight_dtype=jnp.bfloat16)
    x_rec_b, z_mean_b, z_log_var_b = vae_forward(x, eps, prep_bf16)
    jax.block_until_ready((x_rec_b, z_mean_b, z_log_var_b))
    assert jnp.allclose(x_rec_b, xr_ref, atol=1e-1, rtol=1e-1)
    assert jnp.allclose(z_mean_b, mu_ref, atol=1e-1, rtol=1e-1)
    assert jnp.allclose(z_log_var_b, lv_ref, atol=1e-1, rtol=1e-1)

    print("KERNEL_OK")
</pallas_src>

<mosaic_0001>
module attributes {stable_mosaic.version = 11 : i64} {
  func.func @_vae_kernel(%arg0: i32, %arg1: memref<8x128xf32, #tpu.memory_space<vmem>>, %arg2: memref<8x128xf32, #tpu.memory_space<vmem>>, %arg3: memref<128x128xf32, #tpu.memory_space<vmem>>, %arg4: memref<1x128xf32, #tpu.memory_space<vmem>>, %arg5: memref<128x128xf32, #tpu.memory_space<vmem>>, %arg6: memref<1x128xf32, #tpu.memory_space<vmem>>, %arg7: memref<128x256xf32, #tpu.memory_space<vmem>>, %arg8: memref<1x256xf32, #tpu.memory_space<vmem>>, %arg9: memref<128x128xf32, #tpu.memory_space<vmem>>, %arg10: memref<1x128xf32, #tpu.memory_space<vmem>>, %arg11: memref<128x128xf32, #tpu.memory_space<vmem>>, %arg12: memref<1x128xf32, #tpu.memory_space<vmem>>, %arg13: memref<128x128xf32, #tpu.memory_space<vmem>>, %arg14: memref<1x128xf32, #tpu.memory_space<vmem>>, %arg15: memref<8x128xf32, #tpu.memory_space<vmem>>, %arg16: memref<8x256xf32, #tpu.memory_space<vmem>>) attributes {dimension_semantics = [#tpu.dimension_semantics<parallel>], iteration_bounds = array<i64: 1>, scalar_prefetch = 0 : i64, scratch_operands = 0 : i64, tpu.core_type = #tpu.core_type<tc>, window_params = [{transform_indices = @transform_0, window_bounds = array<i64: 8, 128>}, {transform_indices = @transform_1, window_bounds = array<i64: 8, 128>}, {pipeline_mode = #tpu.pipeline_mode<synchronous>, transform_indices = @transform_2, window_bounds = array<i64: 128, 128>}, {pipeline_mode = #tpu.pipeline_mode<synchronous>, transform_indices = @transform_3, window_bounds = array<i64: 1, 128>}, {pipeline_mode = #tpu.pipeline_mode<synchronous>, transform_indices = @transform_4, window_bounds = array<i64: 128, 128>}, {pipeline_mode = #tpu.pipeline_mode<synchronous>, transform_indices = @transform_5, window_bounds = array<i64: 1, 128>}, {pipeline_mode = #tpu.pipeline_mode<synchronous>, transform_indices = @transform_6, window_bounds = array<i64: 128, 256>}, {pipeline_mode = #tpu.pipeline_mode<synchronous>, transform_indices = @transform_7, window_bounds = array<i64: 1, 256>}, {pipeline_mode = #tpu.pipeline_mode<synchronous>, transform_indices = @transform_8, window_bounds = array<i64: 128, 128>}, {pipeline_mode = #tpu.pipeline_mode<synchronous>, transform_indices = @transform_9, window_bounds = array<i64: 1, 128>}, {pipeline_mode = #tpu.pipeline_mode<synchronous>, transform_indices = @transform_10, window_bounds = array<i64: 128, 128>}, {pipeline_mode = #tpu.pipeline_mode<synchronous>, transform_indices = @transform_11, window_bounds = array<i64: 1, 128>}, {pipeline_mode = #tpu.pipeline_mode<synchronous>, transform_indices = @transform_12, window_bounds = array<i64: 128, 128>}, {pipeline_mode = #tpu.pipeline_mode<synchronous>, transform_indices = @transform_13, window_bounds = array<i64: 1, 128>}, {transform_indices = @transform_14, window_bounds = array<i64: 8, 128>}, {transform_indices = @transform_15, window_bounds = array<i64: 8, 256>}]} {
    %c0 = arith.constant 0 : index
    %c0_0 = arith.constant 0 : index
    %0 = vector.load %arg1[%c0, %c0_0] : memref<8x128xf32, #tpu.memory_space<vmem>>, vector<8x128xf32>
    %c0_1 = arith.constant 0 : index
    %c0_2 = arith.constant 0 : index
    %1 = vector.load %arg3[%c0_1, %c0_2] : memref<128x128xf32, #tpu.memory_space<vmem>>, vector<128x128xf32>
    %cst = arith.constant dense<0.000000e+00> : vector<8x128xf32>
    %2 = tpu.matmul %0, %1, %cst {dimension_numbers = #tpu.dot_dimension_numbers<[1], [0], [0], [1], [0, 0, 1, 1], [], []>} : vector<8x128xf32>, vector<128x128xf32>, vector<8x128xf32> -> vector<8x128xf32>
    %c0_3 = arith.constant 0 : index
    %c0_4 = arith.constant 0 : index
    %3 = vector.load %arg4[%c0_3, %c0_4] : memref<1x128xf32, #tpu.memory_space<vmem>>, vector<1x128xf32>
    %4 = vector.broadcast %3 : vector<1x128xf32> to vector<8x128xf32>
    %5 = arith.addf %2, %4 : vector<8x128xf32>
    %cst_5 = arith.constant 0.000000e+00 : f32
    %6 = vector.broadcast %cst_5 : f32 to vector<8x128xf32>
    %7 = arith.maximumf %5, %6 : vector<8x128xf32>
    %c0_6 = arith.constant 0 : index
    %c0_7 = arith.constant 0 : index
    %8 = vector.load %arg5[%c0_6, %c0_7] : memref<128x128xf32, #tpu.memory_space<vmem>>, vector<128x128xf32>
    %cst_8 = arith.constant dense<0.000000e+00> : vector<8x128xf32>
    %9 = tpu.matmul %7, %8, %cst_8 {dimension_numbers = #tpu.dot_dimension_numbers<[1], [0], [0], [1], [0, 0, 1, 1], [], []>} : vector<8x128xf32>, vector<128x128xf32>, vector<8x128xf32> -> vector<8x128xf32>
    %c0_9 = arith.constant 0 : index
    %c0_10 = arith.constant 0 : index
    %10 = vector.load %arg6[%c0_9, %c0_10] : memref<1x128xf32, #tpu.memory_space<vmem>>, vector<1x128xf32>
    %11 = vector.broadcast %10 : vector<1x128xf32> to vector<8x128xf32>
    %12 = arith.addf %9, %11 : vector<8x128xf32>
    %cst_11 = arith.constant 0.000000e+00 : f32
    %13 = vector.broadcast %cst_11 : f32 to vector<8x128xf32>
    %14 = arith.maximumf %12, %13 : vector<8x128xf32>
    %c0_12 = arith.constant 0 : index
    %c0_13 = arith.constant 0 : index
    %15 = vector.load %arg7[%c0_12, %c0_13] : memref<128x256xf32, #tpu.memory_space<vmem>>, vector<128x256xf32>
    %cst_14 = arith.constant dense<0.000000e+00> : vector<8x256xf32>
    %16 = tpu.matmul %14, %15, %cst_14 {dimension_numbers = #tpu.dot_dimension_numbers<[1], [0], [0], [1], [0, 0, 1, 1], [], []>} : vector<8x128xf32>, vector<128x256xf32>, vector<8x256xf32> -> vector<8x256xf32>
    %c0_15 = arith.constant 0 : index
    %c0_16 = arith.constant 0 : index
    %17 = vector.load %arg8[%c0_15, %c0_16] : memref<1x256xf32, #tpu.memory_space<vmem>>, vector<1x256xf32>
    %18 = vector.broadcast %17 : vector<1x256xf32> to vector<8x256xf32>
    %19 = arith.addf %16, %18 : vector<8x256xf32>
    %20 = vector.extract_strided_slice %19 {offsets = [0, 0], sizes = [8, 128], strides = [1, 1]} : vector<8x256xf32> to vector<8x128xf32>
    %21 = vector.extract_strided_slice %19 {offsets = [0, 128], sizes = [8, 128], strides = [1, 1]} : vector<8x256xf32> to vector<8x128xf32>
    %c0_17 = arith.constant 0 : index
    %c0_18 = arith.constant 0 : index
    %22 = vector.load %arg2[%c0_17, %c0_18] : memref<8x128xf32, #tpu.memory_space<vmem>>, vector<8x128xf32>
    %cst_19 = arith.constant 5.000000e-01 : f32
    %23 = vector.broadcast %cst_19 : f32 to vector<8x128xf32>
    %24 = arith.mulf %21, %23 : vector<8x128xf32>
    %25 = math.exp %24 : vector<8x128xf32>
    %26 = arith.mulf %22, %25 : vector<8x128xf32>
    %27 = arith.addf %20, %26 : vector<8x128xf32>
    %c0_20 = arith.constant 0 : index
    %c0_21 = arith.constant 0 : index
    %28 = vector.load %arg9[%c0_20, %c0_21] : memref<128x128xf32, #tpu.memory_space<vmem>>, vector<128x128xf32>
    %cst_22 = arith.constant dense<0.000000e+00> : vector<8x128xf32>
    %29 = tpu.matmul %27, %28, %cst_22 {dimension_numbers = #tpu.dot_dimension_numbers<[1], [0], [0], [1], [0, 0, 1, 1], [], []>} : vector<8x128xf32>, vector<128x128xf32>, vector<8x128xf32> -> vector<8x128xf32>
    %c0_23 = arith.constant 0 : index
    %c0_24 = arith.constant 0 : index
    %30 = vector.load %arg10[%c0_23, %c0_24] : memref<1x128xf32, #tpu.memory_space<vmem>>, vector<1x128xf32>
    %31 = vector.broadcast %30 : vector<1x128xf32> to vector<8x128xf32>
    %32 = arith.addf %29, %31 : vector<8x128xf32>
    %cst_25 = arith.constant 0.000000e+00 : f32
    %33 = vector.broadcast %cst_25 : f32 to vector<8x128xf32>
    %34 = arith.maximumf %32, %33 : vector<8x128xf32>
    %c0_26 = arith.constant 0 : index
    %c0_27 = arith.constant 0 : index
    %35 = vector.load %arg11[%c0_26, %c0_27] : memref<128x128xf32, #tpu.memory_space<vmem>>, vector<128x128xf32>
    %cst_28 = arith.constant dense<0.000000e+00> : vector<8x128xf32>
    %36 = tpu.matmul %34, %35, %cst_28 {dimension_numbers = #tpu.dot_dimension_numbers<[1], [0], [0], [1], [0, 0, 1, 1], [], []>} : vector<8x128xf32>, vector<128x128xf32>, vector<8x128xf32> -> vector<8x128xf32>
    %c0_29 = arith.constant 0 : index
    %c0_30 = arith.constant 0 : index
    %37 = vector.load %arg12[%c0_29, %c0_30] : memref<1x128xf32, #tpu.memory_space<vmem>>, vector<1x128xf32>
    %38 = vector.broadcast %37 : vector<1x128xf32> to vector<8x128xf32>
    %39 = arith.addf %36, %38 : vector<8x128xf32>
    %cst_31 = arith.constant 0.000000e+00 : f32
    %40 = vector.broadcast %cst_31 : f32 to vector<8x128xf32>
    %41 = arith.maximumf %39, %40 : vector<8x128xf32>
    %c0_32 = arith.constant 0 : index
    %c0_33 = arith.constant 0 : index
    %42 = vector.load %arg13[%c0_32, %c0_33] : memref<128x128xf32, #tpu.memory_space<vmem>>, vector<128x128xf32>
    %cst_34 = arith.constant dense<0.000000e+00> : vector<8x128xf32>
    %43 = tpu.matmul %41, %42, %cst_34 {dimension_numbers = #tpu.dot_dimension_numbers<[1], [0], [0], [1], [0, 0, 1, 1], [], []>} : vector<8x128xf32>, vector<128x128xf32>, vector<8x128xf32> -> vector<8x128xf32>
    %c0_35 = arith.constant 0 : index
    %c0_36 = arith.constant 0 : index
    %44 = vector.load %arg14[%c0_35, %c0_36] : memref<1x128xf32, #tpu.memory_space<vmem>>, vector<1x128xf32>
    %45 = vector.broadcast %44 : vector<1x128xf32> to vector<8x128xf32>
    %46 = arith.addf %43, %45 : vector<8x128xf32>
    %47 = arith.negf %46 : vector<8x128xf32>
    %48 = math.exp %47 : vector<8x128xf32>
    %cst_37 = arith.constant 1.000000e+00 : f32
    %49 = vector.broadcast %cst_37 : f32 to vector<8x128xf32>
    %50 = arith.addf %49, %48 : vector<8x128xf32>
    %51 = arith.divf %49, %50 : vector<8x128xf32>
    %c0_38 = arith.constant 0 : index
    %c0_39 = arith.constant 0 : index
    %52 = vector.load %arg15[%c0_38, %c0_39] : memref<8x128xf32, #tpu.memory_space<vmem>>, vector<8x128xf32>
    tpu.vector_store %arg15[%c0_38, %c0_39], %51 {strides = array<i32>} : memref<8x128xf32, #tpu.memory_space<vmem>>, vector<8x128xf32>,
    %c0_40 = arith.constant 0 : index
    %c0_41 = arith.constant 0 : index
    %53 = vector.load %arg16[%c0_40, %c0_41] : memref<8x256xf32, #tpu.memory_space<vmem>>, vector<8x256xf32>
    tpu.vector_store %arg16[%c0_40, %c0_41], %19 {strides = array<i32>} : memref<8x256xf32, #tpu.memory_space<vmem>>, vector<8x256xf32>,
    return
  }
  func.func @transform_0(%arg0: i32) -> (i32, i32) {
    %c0_i32 = arith.constant 0 : i32
    %c0_i32_0 = arith.constant 0 : i32
    return %arg0, %c0_i32 : i32, i32
  }
  func.func @transform_1(%arg0: i32) -> (i32, i32) {
    %c0_i32 = arith.constant 0 : i32
    %c0_i32_0 = arith.constant 0 : i32
    return %arg0, %c0_i32 : i32, i32
  }
  func.func @transform_2(%arg0: i32) -> (i32, i32) {
    %c0_i32 = arith.constant 0 : i32
    %c0_i32_0 = arith.constant 0 : i32
    %c0_i32_1 = arith.constant 0 : i32
    return %c0_i32, %c0_i32_0 : i32, i32
  }
  func.func @transform_3(%arg0: i32) -> (i32, i32) {
    %c0_i32 = arith.constant 0 : i32
    %c0_i32_0 = arith.constant 0 : i32
    %c0_i32_1 = arith.constant 0 : i32
    return %c0_i32, %c0_i32_0 : i32, i32
  }
  func.func @transform_4(%arg0: i32) -> (i32, i32) {
    %c0_i32 = arith.constant 0 : i32
    %c0_i32_0 = arith.constant 0 : i32
    %c0_i32_1 = arith.constant 0 : i32
    return %c0_i32, %c0_i32_0 : i32, i32
  }
  func.func @transform_5(%arg0: i32) -> (i32, i32) {
    %c0_i32 = arith.constant 0 : i32
    %c0_i32_0 = arith.constant 0 : i32
    %c0_i32_1 = arith.constant 0 : i32
    return %c0_i32, %c0_i32_0 : i32, i32
  }
  func.func @transform_6(%arg0: i32) -> (i32, i32) {
    %c0_i32 = arith.constant 0 : i32
    %c0_i32_0 = arith.constant 0 : i32
    %c0_i32_1 = arith.constant 0 : i32
    return %c0_i32, %c0_i32_0 : i32, i32
  }
  func.func @transform_7(%arg0: i32) -> (i32, i32) {
    %c0_i32 = arith.constant 0 : i32
    %c0_i32_0 = arith.constant 0 : i32
    %c0_i32_1 = arith.constant 0 : i32
    return %c0_i32, %c0_i32_0 : i32, i32
  }
  func.func @transform_8(%arg0: i32) -> (i32, i32) {
    %c0_i32 = arith.constant 0 : i32
    %c0_i32_0 = arith.constant 0 : i32
    %c0_i32_1 = arith.constant 0 : i32
    return %c0_i32, %c0_i32_0 : i32, i32
  }
  func.func @transform_9(%arg0: i32) -> (i32, i32) {
    %c0_i32 = arith.constant 0 : i32
    %c0_i32_0 = arith.constant 0 : i32
    %c0_i32_1 = arith.constant 0 : i32
    return %c0_i32, %c0_i32_0 : i32, i32
  }
  func.func @transform_10(%arg0: i32) -> (i32, i32) {
    %c0_i32 = arith.constant 0 : i32
    %c0_i32_0 = arith.constant 0 : i32
    %c0_i32_1 = arith.constant 0 : i32
    return %c0_i32, %c0_i32_0 : i32, i32
  }
  func.func @transform_11(%arg0: i32) -> (i32, i32) {
    %c0_i32 = arith.constant 0 : i32
    %c0_i32_0 = arith.constant 0 : i32
    %c0_i32_1 = arith.constant 0 : i32
    return %c0_i32, %c0_i32_0 : i32, i32
  }
  func.func @transform_12(%arg0: i32) -> (i32, i32) {
    %c0_i32 = arith.constant 0 : i32
    %c0_i32_0 = arith.constant 0 : i32
    %c0_i32_1 = arith.constant 0 : i32
    return %c0_i32, %c0_i32_0 : i32, i32
  }
  func.func @transform_13(%arg0: i32) -> (i32, i32) {
    %c0_i32 = arith.constant 0 : i32
    %c0_i32_0 = arith.constant 0 : i32
    %c0_i32_1 = arith.constant 0 : i32
    return %c0_i32, %c0_i32_0 : i32, i32
  }
  func.func @transform_14(%arg0: i32) -> (i32, i32) {
    %c0_i32 = arith.constant 0 : i32
    %c0_i32_0 = arith.constant 0 : i32
    return %arg0, %c0_i32 : i32, i32
  }
  func.func @transform_15(%arg0: i32) -> (i32, i32) {
    %c0_i32 = arith.constant 0 : i32
    %c0_i32_0 = arith.constant 0 : i32
    return %arg0, %c0_i32 : i32, i32
  }
}

module attributes {stable_mosaic.version = 11 : i64} {
  func.func @_vae_kernel(%arg0: i32, %arg1: memref<8x128xf32, #tpu.memory_space<vmem>>, %arg2: memref<8x128xf32, #tpu.memory_space<vmem>>, %arg3: memref<128x128xf32, #tpu.memory_space<vmem>>, %arg4: memref<1x128xf32, #tpu.memory_space<vmem>>, %arg5: memref<128x128xf32, #tpu.memory_space<vmem>>, %arg6: memref<1x128xf32, #tpu.memory_space<vmem>>, %arg7: memref<128x256xf32, #tpu.memory_space<vmem>>, %arg8: memref<1x256xf32, #tpu.memory_space<vmem>>, %arg9: memref<128x128xf32, #tpu.memory_space<vmem>>, %arg10: memref<1x128xf32, #tpu.memory_space<vmem>>, %arg11: memref<128x128xf32, #tpu.memory_space<vmem>>, %arg12: memref<1x128xf32, #tpu.memory_space<vmem>>, %arg13: memref<128x128xf32, #tpu.memory_space<vmem>>, %arg14: memref<1x128xf32, #tpu.memory_space<vmem>>, %arg15: memref<8x128xf32, #tpu.memory_space<vmem>>, %arg16: memref<8x256xf32, #tpu.memory_space<vmem>>) attributes {dimension_semantics = [#tpu.dimension_semantics<parallel>], iteration_bounds = array<i64: 1>, scalar_prefetch = 0 : i64, scratch_operands = 0 : i64, tpu.core_type = #tpu.core_type<tc>, window_params = [{transform_indices = @transform_0, window_bounds = array<i64: 8, 128>}, {transform_indices = @transform_1, window_bounds = array<i64: 8, 128>}, {pipeline_mode = #tpu.pipeline_mode<synchronous>, transform_indices = @transform_2, window_bounds = array<i64: 128, 128>}, {pipeline_mode = #tpu.pipeline_mode<synchronous>, transform_indices = @transform_3, window_bounds = array<i64: 1, 128>}, {pipeline_mode = #tpu.pipeline_mode<synchronous>, transform_indices = @transform_4, window_bounds = array<i64: 128, 128>}, {pipeline_mode = #tpu.pipeline_mode<synchronous>, transform_indices = @transform_5, window_bounds = array<i64: 1, 128>}, {pipeline_mode = #tpu.pipeline_mode<synchronous>, transform_indices = @transform_6, window_bounds = array<i64: 128, 256>}, {pipeline_mode = #tpu.pipeline_mode<synchronous>, transform_indices = @transform_7, window_bounds = array<i64: 1, 256>}, {pipeline_mode = #tpu.pipeline_mode<synchronous>, transform_indices = @transform_8, window_bounds = array<i64: 128, 128>}, {pipeline_mode = #tpu.pipeline_mode<synchronous>, transform_indices = @transform_9, window_bounds = array<i64: 1, 128>}, {pipeline_mode = #tpu.pipeline_mode<synchronous>, transform_indices = @transform_10, window_bounds = array<i64: 128, 128>}, {pipeline_mode = #tpu.pipeline_mode<synchronous>, transform_indices = @transform_11, window_bounds = array<i64: 1, 128>}, {pipeline_mode = #tpu.pipeline_mode<synchronous>, transform_indices = @transform_12, window_bounds = array<i64: 128, 128>}, {pipeline_mode = #tpu.pipeline_mode<synchronous>, transform_indices = @transform_13, window_bounds = array<i64: 1, 128>}, {transform_indices = @transform_14, window_bounds = array<i64: 8, 128>}, {transform_indices = @transform_15, window_bounds = array<i64: 8, 256>}]} {
    %c0 = arith.constant 0 : index
    %c0_0 = arith.constant 0 : index
    %0 = vector.load %arg1[%c0, %c0_0] : memref<8x128xf32, #tpu.memory_space<vmem>>, vector<8x128xf32>
    %c0_1 = arith.constant 0 : index
    %c0_2 = arith.constant 0 : index
    %1 = vector.load %arg3[%c0_1, %c0_2] : memref<128x128xf32, #tpu.memory_space<vmem>>, vector<128x128xf32>
    %cst = arith.constant dense<0.000000e+00> : vector<8x128xf32>
    %2 = tpu.matmul %0, %1, %cst {dimension_numbers = #tpu.dot_dimension_numbers<[1], [0], [0], [1], [0, 0, 1, 1], [], []>} : vector<8x128xf32>, vector<128x128xf32>, vector<8x128xf32> -> vector<8x128xf32>
    %c0_3 = arith.constant 0 : index
    %c0_4 = arith.constant 0 : index
    %3 = vector.load %arg4[%c0_3, %c0_4] : memref<1x128xf32, #tpu.memory_space<vmem>>, vector<1x128xf32>
    %4 = vector.broadcast %3 : vector<1x128xf32> to vector<8x128xf32>
    %5 = arith.addf %2, %4 : vector<8x128xf32>
    %cst_5 = arith.constant 0.000000e+00 : f32
    %6 = vector.broadcast %cst_5 : f32 to vector<8x128xf32>
    %7 = arith.maximumf %5, %6 : vector<8x128xf32>
    %c0_6 = arith.constant 0 : index
    %c0_7 = arith.constant 0 : index
    %8 = vector.load %arg5[%c0_6, %c0_7] : memref<128x128xf32, #tpu.memory_space<vmem>>, vector<128x128xf32>
    %cst_8 = arith.constant dense<0.000000e+00> : vector<8x128xf32>
    %9 = tpu.matmul %7, %8, %cst_8 {dimension_numbers = #tpu.dot_dimension_numbers<[1], [0], [0], [1], [0, 0, 1, 1], [], []>} : vector<8x128xf32>, vector<128x128xf32>, vector<8x128xf32> -> vector<8x128xf32>
    %c0_9 = arith.constant 0 : index
    %c0_10 = arith.constant 0 : index
    %10 = vector.load %arg6[%c0_9, %c0_10] : memref<1x128xf32, #tpu.memory_space<vmem>>, vector<1x128xf32>
    %11 = vector.broadcast %10 : vector<1x128xf32> to vector<8x128xf32>
    %12 = arith.addf %9, %11 : vector<8x128xf32>
    %cst_11 = arith.constant 0.000000e+00 : f32
    %13 = vector.broadcast %cst_11 : f32 to vector<8x128xf32>
    %14 = arith.maximumf %12, %13 : vector<8x128xf32>
    %c0_12 = arith.constant 0 : index
    %c0_13 = arith.constant 0 : index
    %15 = vector.load %arg7[%c0_12, %c0_13] : memref<128x256xf32, #tpu.memory_space<vmem>>, vector<128x256xf32>
    %cst_14 = arith.constant dense<0.000000e+00> : vector<8x256xf32>
    %16 = tpu.matmul %14, %15, %cst_14 {dimension_numbers = #tpu.dot_dimension_numbers<[1], [0], [0], [1], [0, 0, 1, 1], [], []>} : vector<8x128xf32>, vector<128x256xf32>, vector<8x256xf32> -> vector<8x256xf32>
    %c0_15 = arith.constant 0 : index
    %c0_16 = arith.constant 0 : index
    %17 = vector.load %arg8[%c0_15, %c0_16] : memref<1x256xf32, #tpu.memory_space<vmem>>, vector<1x256xf32>
    %18 = vector.broadcast %17 : vector<1x256xf32> to vector<8x256xf32>
    %19 = arith.addf %16, %18 : vector<8x256xf32>
    %20 = vector.extract_strided_slice %19 {offsets = [0, 0], sizes = [8, 128], strides = [1, 1]} : vector<8x256xf32> to vector<8x128xf32>
    %21 = vector.extract_strided_slice %19 {offsets = [0, 128], sizes = [8, 128], strides = [1, 1]} : vector<8x256xf32> to vector<8x128xf32>
    %c0_17 = arith.constant 0 : index
    %c0_18 = arith.constant 0 : index
    %22 = vector.load %arg2[%c0_17, %c0_18] : memref<8x128xf32, #tpu.memory_space<vmem>>, vector<8x128xf32>
    %cst_19 = arith.constant 5.000000e-01 : f32
    %23 = vector.broadcast %cst_19 : f32 to vector<8x128xf32>
    %24 = arith.mulf %21, %23 : vector<8x128xf32>
    %25 = math.exp %24 : vector<8x128xf32>
    %26 = arith.mulf %22, %25 : vector<8x128xf32>
    %27 = arith.addf %20, %26 : vector<8x128xf32>
    %c0_20 = arith.constant 0 : index
    %c0_21 = arith.constant 0 : index
    %28 = vector.load %arg9[%c0_20, %c0_21] : memref<128x128xf32, #tpu.memory_space<vmem>>, vector<128x128xf32>
    %cst_22 = arith.constant dense<0.000000e+00> : vector<8x128xf32>
    %29 = tpu.matmul %27, %28, %cst_22 {dimension_numbers = #tpu.dot_dimension_numbers<[1], [0], [0], [1], [0, 0, 1, 1], [], []>} : vector<8x128xf32>, vector<128x128xf32>, vector<8x128xf32> -> vector<8x128xf32>
    %c0_23 = arith.constant 0 : index
    %c0_24 = arith.constant 0 : index
    %30 = vector.load %arg10[%c0_23, %c0_24] : memref<1x128xf32, #tpu.memory_space<vmem>>, vector<1x128xf32>
    %31 = vector.broadcast %30 : vector<1x128xf32> to vector<8x128xf32>
    %32 = arith.addf %29, %31 : vector<8x128xf32>
    %cst_25 = arith.constant 0.000000e+00 : f32
    %33 = vector.broadcast %cst_25 : f32 to vector<8x128xf32>
    %34 = arith.maximumf %32, %33 : vector<8x128xf32>
    %c0_26 = arith.constant 0 : index
    %c0_27 = arith.constant 0 : index
    %35 = vector.load %arg11[%c0_26, %c0_27] : memref<128x128xf32, #tpu.memory_space<vmem>>, vector<128x128xf32>
    %cst_28 = arith.constant dense<0.000000e+00> : vector<8x128xf32>
    %36 = tpu.matmul %34, %35, %cst_28 {dimension_numbers = #tpu.dot_dimension_numbers<[1], [0], [0], [1], [0, 0, 1, 1], [], []>} : vector<8x128xf32>, vector<128x128xf32>, vector<8x128xf32> -> vector<8x128xf32>
    %c0_29 = arith.constant 0 : index
    %c0_30 = arith.constant 0 : index
    %37 = vector.load %arg12[%c0_29, %c0_30] : memref<1x128xf32, #tpu.memory_space<vmem>>, vector<1x128xf32>
    %38 = vector.broadcast %37 : vector<1x128xf32> to vector<8x128xf32>
    %39 = arith.addf %36, %38 : vector<8x128xf32>
    %cst_31 = arith.constant 0.000000e+00 : f32
    %40 = vector.broadcast %cst_31 : f32 to vector<8x128xf32>
    %41 = arith.maximumf %39, %40 : vector<8x128xf32>
    %c0_32 = arith.constant 0 : index
    %c0_33 = arith.constant 0 : index
    %42 = vector.load %arg13[%c0_32, %c0_33] : memref<128x128xf32, #tpu.memory_space<vmem>>, vector<128x128xf32>
    %cst_34 = arith.constant dense<0.000000e+00> : vector<8x128xf32>
    %43 = tpu.matmul %41, %42, %cst_34 {dimension_numbers = #tpu.dot_dimension_numbers<[1], [0], [0], [1], [0, 0, 1, 1], [], []>} : vector<8x128xf32>, vector<128x128xf32>, vector<8x128xf32> -> vector<8x128xf32>
    %c0_35 = arith.constant 0 : index
    %c0_36 = arith.constant 0 : index
    %44 = vector.load %arg14[%c0_35, %c0_36] : memref<1x128xf32, #tpu.memory_space<vmem>>, vector<1x128xf32>
    %45 = vector.broadcast %44 : vector<1x128xf32> to vector<8x128xf32>
    %46 = arith.addf %43, %45 : vector<8x128xf32>
    %47 = arith.negf %46 : vector<8x128xf32>
    %48 = math.exp %47 : vector<8x128xf32>
    %cst_37 = arith.constant 1.000000e+00 : f32
    %49 = vector.broadcast %cst_37 : f32 to vector<8x128xf32>
    %50 = arith.addf %49, %48 : vector<8x128xf32>
    %51 = arith.divf %49, %50 : vector<8x128xf32>
    %c0_38 = arith.constant 0 : index
    %c0_39 = arith.constant 0 : index
    %52 = vector.load %arg15[%c0_38, %c0_39] : memref<8x128xf32, #tpu.memory_space<vmem>>, vector<8x128xf32>
    tpu.vector_store %arg15[%c0_38, %c0_39], %51 {strides = array<i32>} : memref<8x128xf32, #tpu.memory_space<vmem>>, vector<8x128xf32>,
    %c0_40 = arith.constant 0 : index
    %c0_41 = arith.constant 0 : index
    %53 = vector.load %arg16[%c0_40, %c0_41] : memref<8x256xf32, #tpu.memory_space<vmem>>, vector<8x256xf32>
    tpu.vector_store %arg16[%c0_40, %c0_41], %19 {strides = array<i32>} : memref<8x256xf32, #tpu.memory_space<vmem>>, vector<8x256xf32>,
    return
  }
  func.func @transform_0(%arg0: i32) -> (i32, i32) {
    %c0_i32 = arith.constant 0 : i32
    %c0_i32_0 = arith.constant 0 : i32
    return %arg0, %c0_i32 : i32, i32
  }
  func.func @transform_1(%arg0: i32) -> (i32, i32) {
    %c0_i32 = arith.constant 0 : i32
    %c0_i32_0 = arith.constant 0 : i32
    return %arg0, %c0_i32 : i32, i32
  }
  func.func @transform_2(%arg0: i32) -> (i32, i32) {
    %c0_i32 = arith.constant 0 : i32
    %c0_i32_0 = arith.constant 0 : i32
    %c0_i32_1 = arith.constant 0 : i32
    return %c0_i32, %c0_i32_0 : i32, i32
  }
  func.func @transform_3(%arg0: i32) -> (i32, i32) {
    %c0_i32 = arith.constant 0 : i32
    %c0_i32_0 = arith.constant 0 : i32
    %c0_i32_1 = arith.constant 0 : i32
    return %c0_i32, %c0_i32_0 : i32, i32
  }
  func.func @transform_4(%arg0: i32) -> (i32, i32) {
    %c0_i32 = arith.constant 0 : i32
    %c0_i32_0 = arith.constant 0 : i32
    %c0_i32_1 = arith.constant 0 : i32
    return %c0_i32, %c0_i32_0 : i32, i32
  }
  func.func @transform_5(%arg0: i32) -> (i32, i32) {
    %c0_i32 = arith.constant 0 : i32
    %c0_i32_0 = arith.constant 0 : i32
    %c0_i32_1 = arith.constant 0 : i32
    return %c0_i32, %c0_i32_0 : i32, i32
  }
  func.func @transform_6(%arg0: i32) -> (i32, i32) {
    %c0_i32 = arith.constant 0 : i32
    %c0_i32_0 = arith.constant 0 : i32
    %c0_i32_1 = arith.constant 0 : i32
    return %c0_i32, %c0_i32_0 : i32, i32
  }
  func.func @transform_7(%arg0: i32) -> (i32, i32) {
    %c0_i32 = arith.constant 0 : i32
    %c0_i32_0 = arith.constant 0 : i32
    %c0_i32_1 = arith.constant 0 : i32
    return %c0_i32, %c0_i32_0 : i32, i32
  }
  func.func @transform_8(%arg0: i32) -> (i32, i32) {
    %c0_i32 = arith.constant 0 : i32
    %c0_i32_0 = arith.constant 0 : i32
    %c0_i32_1 = arith.constant 0 : i32
    return %c0_i32, %c0_i32_0 : i32, i32
  }
  func.func @transform_9(%arg0: i32) -> (i32, i32) {
    %c0_i32 = arith.constant 0 : i32
    %c0_i32_0 = arith.constant 0 : i32
    %c0_i32_1 = arith.constant 0 : i32
    return %c0_i32, %c0_i32_0 : i32, i32
  }
  func.func @transform_10(%arg0: i32) -> (i32, i32) {
    %c0_i32 = arith.constant 0 : i32
    %c0_i32_0 = arith.constant 0 : i32
    %c0_i32_1 = arith.constant 0 : i32
    return %c0_i32, %c0_i32_0 : i32, i32
  }
  func.func @transform_11(%arg0: i32) -> (i32, i32) {
    %c0_i32 = arith.constant 0 : i32
    %c0_i32_0 = arith.constant 0 : i32
    %c0_i32_1 = arith.constant 0 : i32
    return %c0_i32, %c0_i32_0 : i32, i32
  }
  func.func @transform_12(%arg0: i32) -> (i32, i32) {
    %c0_i32 = arith.constant 0 : i32
    %c0_i32_0 = arith.constant 0 : i32
    %c0_i32_1 = arith.constant 0 : i32
    return %c0_i32, %c0_i32_0 : i32, i32
  }
  func.func @transform_13(%arg0: i32) -> (i32, i32) {
    %c0_i32 = arith.constant 0 : i32
    %c0_i32_0 = arith.constant 0 : i32
    %c0_i32_1 = arith.constant 0 : i32
    return %c0_i32, %c0_i32_0 : i32, i32
  }
  func.func @transform_14(%arg0: i32) -> (i32, i32) {
    %c0_i32 = arith.constant 0 : i32
    %c0_i32_0 = arith.constant 0 : i32
    return %arg0, %c0_i32 : i32, i32
  }
  func.func @transform_15(%arg0: i32) -> (i32, i32) {
    %c0_i32 = arith.constant 0 : i32
    %c0_i32_0 = arith.constant 0 : i32
    return %arg0, %c0_i32 : i32, i32
  }
}

</mosaic_0001>

<bundles_post_ra>
// kernel: tpu_custom_call.1
= control target key start
LH: loop header
LB: loop body
LE: loop exit
PB: predicated region body
PF: predicated region fallthrough
CT: control target
= control target key end

     0   :  { %21 = vsyncpa [#allocation3], 0  ;;  %s1772_s0 = inlined_call_operand.hbm [shape: f32[8,128], index: 0, kind: input, shape index: {}]   ;;  %s1773_s1 = inlined_call_operand.hbm [shape: f32[8,128], index: 1, kind: input, shape index: {}]   ;;  %s1774_s2 = inlined_call_operand.hbm [shape: f32[128,128], index: 2, kind: input, shape index: {}]   ;;  %s1775_s3 = inlined_call_operand.vmem [shape: f32[1,128], index: 3, kind: input, shape index: {}]   ;;  %s1776_s4 = inlined_call_operand.hbm [shape: f32[128,128], index: 4, kind: input, shape index: {}]   ;;  %s1777_s5 = inlined_call_operand.vmem [shape: f32[1,128], index: 5, kind: input, shape index: {}]   ;;  %s1778_s6 = inlined_call_operand.hbm [shape: f32[128,256], index: 6, kind: input, shape index: {}]   ;;  %s1779_s7 = inlined_call_operand.vmem [shape: f32[1,256], index: 7, kind: input, shape index: {}]   ;;  %s1780_s8 = inlined_call_operand.hbm [shape: f32[128,128], index: 8, kind: input, shape index: {}]   ;;  %s1781_s9 = inlined_call_operand.vmem [shape: f32[1,128], index: 9, kind: input, shape index: {}]   ;;  %s1782_s10 = inlined_call_operand.hbm [shape: f32[128,128], index: 10, kind: input, shape index: {}]   ;;  %s1783_s11 = inlined_call_operand.vmem [shape: f32[1,128], index: 11, kind: input, shape index: {}]   ;;  %s1784_s12 = inlined_call_operand.hbm [shape: f32[128,128], index: 12, kind: input, shape index: {}]   ;;  %s1785_s13 = inlined_call_operand.vmem [shape: f32[1,128], index: 13, kind: input, shape index: {}]   ;;  %s1786_s14 = inlined_call_operand.hbm [shape: f32[8,128], index: 14, kind: output, shape index: {0}]   ;;  %s1787_s15 = inlined_call_operand.hbm [shape: f32[8,256], index: 15, kind: output, shape index: {1}]  }
   0x1   :  { %22 = vsyncpa [#allocation6], 0 }
   0x2   :  { %23 = vsyncpa [#allocation9], 0 }
   0x3   :  { %24 = vsyncpa [#allocation12], 0 }
   0x4   :  { %25 = vsyncpa [#allocation15], 0 }
   0x5   :  { %26 = vsyncpa [#allocation4], 0 }
   0x6   :  { %27 = vsyncpa [#allocation18], 0  ;;  %s1464_s18 = smov [#allocation5]   ;;  %s1230_s22 = scalar_lea.hbm %s1773_s1, 128 }
   0x7   :  { %s44_s19 = sshll.u32 %s1464_s18, 4  ;;  %p1231_p0 = scmp.ne.s32.totalorder %s1773_s1, %s1230_s22  ;;  %s45_s19 = int_to_ptr.vmem [resolvable:$true] %s44_s19 }
   0x8   :  { %p1234_p1 = scmp.lt.u32.totalorder %s1230_s22, %s1773_s1 }
   0xa   :  { %p1236_p2 = pnand %p1234_p1, %p1231_p0 }
   0xc   :  { %1239 = shalt.err (!%p1236_p2)
}
   0xd   :  { %s1240_s27 = scalar_lea.vmem %s45_s19, 128  ;;  %p1245_p4 = scmp.lt.s32.totalorder %s45_s19, %s45_s19 }
   0xe   :  { %p1241_p3 = scmp.ne.s32.totalorder %s45_s19, %s1240_s27  ;;  %p1246_p5 = scmp.lt.s32.totalorder %s1240_s27, %s1240_s27 }
  0x10   :  { %p1247_p6 = por %p1246_p5, %p1245_p4 }
  0x12   :  { %p1248_p7 = pnand %p1247_p6, %p1241_p3 }
  0x14   :  { %1251 = shalt.err (!%p1248_p7)
}
  0x15   :  { %47 = dma.hbm_to_vmem [thread:$0]  %s1773_s1, 128, %s45_s19, [#allocation6]  }
  0x16   :  { %s1465_s30 = smov [#allocation8]   ;;  %s1466_s17 = smov [#allocation11]  }
  0x17   :  { %s67_s16 = sshll.u32 %s1465_s30, 4  ;;  %s95_s18 = sshll.u32 %s1466_s17, 4  ;;  %s68_s16 = int_to_ptr.vmem [resolvable:$true] %s67_s16  ;;  %s96_s18 = int_to_ptr.vmem [resolvable:$true] %s95_s18 }
  0x18   :  { %s1252_s22 = scalar_lea.hbm %s1776_s4, 2048 }
  0x19   :  { %p1253_p8 = scmp.ne.s32.totalorder %s1776_s4, %s1252_s22  ;;  %p1256_p9 = scmp.lt.u32.totalorder %s1252_s22, %s1776_s4 }
  0x1b   :  { %p1258_p10 = pnand %p1256_p9, %p1253_p8 }
  0x1d   :  { %1261 = shalt.err (!%p1258_p10)
}
  0x1e   :  { %s1262_s1 = scalar_lea.vmem %s68_s16, 2048  ;;  %p1267_p12 = scmp.lt.s32.totalorder %s68_s16, %s68_s16 }
  0x1f   :  { %p1263_p11 = scmp.ne.s32.totalorder %s68_s16, %s1262_s1  ;;  %p1268_p13 = scmp.lt.s32.totalorder %s1262_s1, %s1262_s1 }
  0x21   :  { %p1269_p0 = por %p1268_p13, %p1267_p12 }
  0x23   :  { %p1270_p1 = pnand %p1269_p0, %p1263_p11 }
  0x25   :  { %1273 = shalt.err (!%p1270_p1)
}
  0x26   :  { %s1467_s19 = smov 128   ;;  %s1468_s27 = smov 8  }
  0x27   :  { %73 = dma.hbm_to_vmem [thread:$0]  %s1776_s4, 2048, %s68_s16, [#allocation9], %s1467_s19, %s1467_s19, %s1468_s27  }
  0x28   :  { %s1274_s20 = scalar_lea.hbm %s1780_s8, 2048 }
  0x29   :  { %p1275_p2 = scmp.ne.s32.totalorder %s1780_s8, %s1274_s20  ;;  %p1278_p3 = scmp.lt.u32.totalorder %s1274_s20, %s1780_s8 }
  0x2b   :  { %p1280_p4 = pnand %p1278_p3, %p1275_p2 }
  0x2d   :  { %1283 = shalt.err (!%p1280_p4)
}
  0x2e   :  { %s1284_s25 = scalar_lea.vmem %s96_s18, 2048  ;;  %p1289_p6 = scmp.lt.s32.totalorder %s96_s18, %s96_s18 }
  0x2f   :  { %p1285_p5 = scmp.ne.s32.totalorder %s96_s18, %s1284_s25  ;;  %p1290_p7 = scmp.lt.s32.totalorder %s1284_s25, %s1284_s25 }
  0x31   :  { %p1291_p8 = por %p1290_p7, %p1289_p6 }
  0x33   :  { %p1292_p9 = pnand %p1291_p8, %p1285_p5 }
  0x35   :  { %1295 = shalt.err (!%p1292_p9)
}
  0x36   :  { %101 = dma.hbm_to_vmem [thread:$0]  %s1780_s8, 2048, %s96_s18, [#allocation12], %s1467_s19, %s1467_s19, %s1468_s27  }
  0x37   :  { %s1469_s26 = smov [#allocation2]   ;;  %s1470_s28 = smov [#allocation7]  }
  0x38   :  { %s34_s1 = sshll.u32 %s1469_s26, 4  ;;  %s53_s29 = sshll.u32 %s1470_s28, 4  ;;  %s35_s1 = int_to_ptr.vmem [resolvable:$true] %s34_s1  ;;  %s54_s29 = int_to_ptr.vmem [resolvable:$true] %s53_s29 }
  0x39   :  { %s1296_s20 = scalar_lea.hbm %s1772_s0, 128 }
  0x3a   :  { %p1297_p10 = scmp.ne.s32.totalorder %s1772_s0, %s1296_s20  ;;  %p1300_p11 = scmp.lt.u32.totalorder %s1296_s20, %s1772_s0 }
  0x3c   :  { %p1302_p12 = pnand %p1300_p11, %p1297_p10 }
  0x3e   :  { %1305 = shalt.err (!%p1302_p12)
}
  0x3f   :  { %s1306_s8 = scalar_lea.vmem %s35_s1, 128  ;;  %p1311_p0 = scmp.lt.s32.totalorder %s35_s1, %s35_s1 }
  0x40   :  { %p1307_p13 = scmp.ne.s32.totalorder %s35_s1, %s1306_s8  ;;  %p1312_p1 = scmp.lt.s32.totalorder %s1306_s8, %s1306_s8 }
  0x42   :  { %p1313_p2 = por %p1312_p1, %p1311_p0 }
  0x44   :  { %p1314_p3 = pnand %p1313_p2, %p1307_p13 }
  0x46   :  { %1317 = shalt.err (!%p1314_p3)
}
  0x47   :  { %37 = dma.hbm_to_vmem [thread:$0]  %s1772_s0, 128, %s35_s1, [#allocation3]  }
  0x48   :  { %s1318_s26 = scalar_lea.hbm %s1774_s2, 2048 }
  0x49   :  { %p1319_p4 = scmp.ne.s32.totalorder %s1774_s2, %s1318_s26  ;;  %p1322_p5 = scmp.lt.u32.totalorder %s1318_s26, %s1774_s2 }
  0x4b   :  { %p1324_p6 = pnand %p1322_p5, %p1319_p4 }
  0x4d   :  { %1327 = shalt.err (!%p1324_p6)
}
  0x4e   :  { %s1328_s21 = scalar_lea.vmem %s54_s29, 2048  ;;  %p1333_p8 = scmp.lt.s32.totalorder %s54_s29, %s54_s29 }
  0x4f   :  { %p1329_p7 = scmp.ne.s32.totalorder %s54_s29, %s1328_s21  ;;  %p1334_p9 = scmp.lt.s32.totalorder %s1328_s21, %s1328_s21 }
  0x51   :  { %p1335_p10 = por %p1334_p9, %p1333_p8 }
  0x53   :  { %p1336_p11 = pnand %p1335_p10, %p1329_p7 }
  0x55   :  { %1339 = shalt.err (!%p1336_p11)
}
  0x56   :  { %59 = dma.hbm_to_vmem [thread:$0]  %s1774_s2, 2048, %s54_s29, [#allocation6], %s1467_s19, %s1467_s19, %s1468_s27  }
  0x57   :  { %s1471_s22 = smov [#allocation10]   ;;  %s1340_s18 = scalar_lea.hbm %s1778_s6, 4096 }
  0x58   :  { %s81_s23 = sshll.u32 %s1471_s22, 4  ;;  %p1341_p12 = scmp.ne.s32.totalorder %s1778_s6, %s1340_s18  ;;  %s82_s23 = int_to_ptr.vmem [resolvable:$true] %s81_s23 }
  0x59   :  { %p1344_p13 = scmp.lt.u32.totalorder %s1340_s18, %s1778_s6 }
  0x5b   :  { %p1346_p0 = pnand %p1344_p13, %p1341_p12 }
  0x5d   :  { %1349 = shalt.err (!%p1346_p0)
}
  0x5e   :  { %s1350_s28 = scalar_lea.vmem %s82_s23, 4096  ;;  %p1355_p2 = scmp.lt.s32.totalorder %s82_s23, %s82_s23 }
  0x5f   :  { %p1351_p1 = scmp.ne.s32.totalorder %s82_s23, %s1350_s28  ;;  %p1356_p3 = scmp.lt.s32.totalorder %s1350_s28, %s1350_s28 }
  0x61   :  { %p1357_p4 = por %p1356_p3, %p1355_p2 }
  0x63   :  { %p1358_p5 = pnand %p1357_p4, %p1351_p1 }
  0x65   :  { %1361 = shalt.err (!%p1358_p5)
}
  0x66   :  { %s1472_s2 = smov 256   ;;  %s1473_s29 = smov 16  }
  0x67   :  { %87 = dma.hbm_to_vmem [thread:$0]  %s1778_s6, 4096, %s82_s23, [#allocation9], %s1472_s2, %s1472_s2, %s1473_s29  }
  0x68   :  { %s1474_s20 = smov [#allocation13]   ;;  %s1475_s0 = smov [#allocation14]  }
  0x69   :  { %s109_s21 = sshll.u32 %s1474_s20, 4  ;;  %s123_s1 = sshll.u32 %s1475_s0, 4  ;;  %s110_s21 = int_to_ptr.vmem [resolvable:$true] %s109_s21  ;;  %s1642_s1 = int_to_ptr.vmem [resolvable:$true] %s123_s1 }
  0x6a   :  { %s1362_s8 = scalar_lea.hbm %s1782_s10, 2048 }
  0x6b   :  { %p1363_p6 = scmp.ne.s32.totalorder %s1782_s10, %s1362_s8  ;;  %p1366_p7 = scmp.lt.u32.totalorder %s1362_s8, %s1782_s10 }
  0x6d   :  { %p1368_p8 = pnand %p1366_p7, %p1363_p6 }
  0x6f   :  { %1371 = shalt.err (!%p1368_p8)
}
  0x70   :  { %s1372_s6 = scalar_lea.vmem %s110_s21, 2048  ;;  %p1377_p10 = scmp.lt.s32.totalorder %s110_s21, %s110_s21 }
  0x71   :  { %p1373_p9 = scmp.ne.s32.totalorder %s110_s21, %s1372_s6  ;;  %p1378_p11 = scmp.lt.s32.totalorder %s1372_s6, %s1372_s6 }
  0x73   :  { %p1379_p12 = por %p1378_p11, %p1377_p10 }
  0x75   :  { %p1380_p13 = pnand %p1379_p12, %p1373_p9 }
  0x77   :  { %1383 = shalt.err (!%p1380_p13)
}
  0x78   :  { %115 = dma.hbm_to_vmem [thread:$0]  %s1782_s10, 2048, %s110_s21, [#allocation12], %s1467_s19, %s1467_s19, %s1468_s27  }
  0x79   :  { %s1384_s29 = scalar_lea.hbm %s1784_s12, 2048 }
  0x7a   :  { %p1385_p0 = scmp.ne.s32.totalorder %s1784_s12, %s1384_s29  ;;  %p1388_p1 = scmp.lt.u32.totalorder %s1384_s29, %s1784_s12 }
  0x7c   :  { %p1390_p2 = pnand %p1388_p1, %p1385_p0 }
  0x7e   :  { %1393 = shalt.err (!%p1390_p2)
}
  0x7f   :  { %s1394_s22 = scalar_lea.vmem %s1642_s1, 2048  ;;  %p1399_p4 = scmp.lt.s32.totalorder %s1642_s1, %s1642_s1 }
  0x80   :  { %p1395_p3 = scmp.ne.s32.totalorder %s1642_s1, %s1394_s22  ;;  %p1400_p5 = scmp.lt.s32.totalorder %s1394_s22, %s1394_s22 }
  0x82   :  { %p1401_p6 = por %p1400_p5, %p1399_p4 }
  0x84   :  { %p1402_p7 = pnand %p1401_p6, %p1395_p3 }
  0x86   :  { %1405 = shalt.err (!%p1402_p7)
}
  0x87   :  { %129 = dma.hbm_to_vmem [thread:$0]  %s1784_s12, 2048, %s1642_s1, [#allocation15], %s1467_s19, %s1467_s19, %s1468_s27  }
  0x88   :  { %1450 = dma.done.wait [#allocation3], 128  }
  0x89   :  { %1451 = vsyncadd [#allocation3], 4294967168 }
  0x8a   :  { %1452 = dma.done.wait [#allocation6], 2176  }
  0x8b   :  { %1453 = vsyncadd [#allocation6], 4294965120 }
  0x8c   :  { %1454 = dma.done.wait [#allocation9], 6144  }
  0x8d   :  { %1455 = vsyncadd [#allocation9], 4294961152 }
  0x8e   :  { %1456 = dma.done.wait [#allocation12], 4096  }
  0x8f   :  { %1457 = vsyncadd [#allocation12], 4294963200 }
  0x90   :  { %1458 = dma.done.wait [#allocation15], 2048  }
  0x91   :  { %1459 = vsyncadd [#allocation15], 4294965248  ;;  %v1476_v0 = vmov 0.0|0.0   ;;  %vm1477_vm0 = vmmov 0   ;;  %v1478_v1 = vmov 0.0   ;;  %v157_v2 = vld [vmem:[#allocation7] sm:$0xff] }
  0x92   :  { %1055 = vmatprep.subr.bf16.mxu0 %v1476_v0  ;;  %912 = vmatprep.mubr.msk.f32.mxu0 %vm1477_vm0, %v1478_v1  ;;  %v158_v3 = vld [vmem:[#allocation7 + $0x8] sm:$0xff]  ;;  %v159_v4 = vld [vmem:[#allocation7 + $0x10] sm:$0xff]  ;;  %v160_v6 = vld [vmem:[#allocation7 + $0x18] sm:$0xff]  ;;  %s1479_s25 = smov [#allocation17]  }
  0x93   :  { %1079 = vmatprep.subr.bf16.mxu1 %v1476_v0  ;;  %947 = vmatprep.mubr.msk.f32.mxu1 %vm1477_vm0, %v1478_v1  ;;  %v1056_v5 = vpack.c.bf16 %v158_v3, %v157_v2  ;;  %v1059_v7 = vpack.c.bf16 %v160_v6, %v159_v4  ;;  %v161_v8 = vld [vmem:[#allocation7 + $0x20] sm:$0xff]  ;;  %v162_v9 = vld [vmem:[#allocation7 + $0x28] sm:$0xff]  ;;  %v253_v12 = vld [vmem:[#allocation8 + $0x10] sm:$0xff] }
  0x94   :  { %v251_v10 = vld [vmem:[#allocation8] sm:$0xff]  ;;  %v252_v11 = vld [vmem:[#allocation8 + $0x8] sm:$0xff]  ;;  %v254_v13 = vld [vmem:[#allocation8 + $0x18] sm:$0xff]  ;;  %v1062_v14 = vpack.c.bf16 %v162_v9, %v161_v8 }
  0x95   :  { %1057 = vmatpush3.bf16.msra.mxu0 %v1056_v5  ;;  %v1080_v15 = vpack.c.bf16 %v252_v11, %v251_v10  ;;  %v163_v16 = vld [vmem:[#allocation7 + $0x30] sm:$0xff]  ;;  %v164_v17 = vld [vmem:[#allocation7 + $0x38] sm:$0xff]  ;;  %v1083_v18 = vpack.c.bf16 %v254_v13, %v253_v12  ;;  %v255_v19 = vld [vmem:[#allocation8 + $0x20] sm:$0xff] }
  0x96   :  { %1058 = vmatprep.subr.bf16.mxu0 %v1476_v0  ;;  %v256_v20 = vld [vmem:[#allocation8 + $0x28] sm:$0xff]  ;;  %v1065_v21 = vpack.c.bf16 %v164_v17, %v163_v16  ;;  %v165_v22 = vld [vmem:[#allocation7 + $0x40] sm:$0xff]  ;;  %v257_v25 = vld [vmem:[#allocation8 + $0x30] sm:$0xff] }
  0x97   :  { %1081 = vmatpush3.bf16.msra.mxu1 %v1080_v15  ;;  %v166_v23 = vld [vmem:[#allocation7 + $0x48] sm:$0xff]  ;;  %v1086_v24 = vpack.c.bf16 %v256_v20, %v255_v19  ;;  %v258_v26 = vld [vmem:[#allocation8 + $0x38] sm:$0xff]  ;;  %v167_v28 = vld [vmem:[#allocation7 + $0x50] sm:$0xff] }
  0x98   :  { %1082 = vmatprep.subr.bf16.mxu1 %v1476_v0  ;;  %v1068_v27 = vpack.c.bf16 %v166_v23, %v165_v22  ;;  %v168_v29 = vld [vmem:[#allocation7 + $0x58] sm:$0xff]  ;;  %v1089_v30 = vpack.c.bf16 %v258_v26, %v257_v25  ;;  %v259_v31 = vld [vmem:[#allocation8 + $0x40] sm:$0xff]  ;;  %v260_v32 = vld [vmem:[#allocation8 + $0x48] sm:$0xff] }
  0x99   :  { %1060 = vmatpush3.bf16.msra.mxu0 %v1059_v7  ;;  %v1071_v33 = vpack.c.bf16 %v168_v29, %v167_v28  ;;  %v169_v34 = vld [vmem:[#allocation7 + $0x60] sm:$0xff]  ;;  %v170_v35 = vld [vmem:[#allocation7 + $0x68] sm:$0xff]  ;;  %v1092_v36 = vpack.c.bf16 %v260_v32, %v259_v31  ;;  %v261_v37 = vld [vmem:[#allocation8 + $0x50] sm:$0xff] }
  0x9a   :  { %1061 = vmatprep.subr.bf16.mxu0 %v1476_v0  ;;  %v262_v38 = vld [vmem:[#allocation8 + $0x58] sm:$0xff]  ;;  %v1074_v39 = vpack.c.bf16 %v170_v35, %v169_v34  ;;  %v171_v40 = vld [vmem:[#allocation7 + $0x70] sm:$0xff]  ;;  %v263_v43 = vld [vmem:[#allocation8 + $0x60] sm:$0xff] }
  0x9b   :  { %1084 = vmatpush3.bf16.msra.mxu1 %v1083_v18  ;;  %v172_v41 = vld [vmem:[#allocation7 + $0x78] sm:$0xff]  ;;  %v1095_v42 = vpack.c.bf16 %v262_v38, %v261_v37  ;;  %v264_v44 = vld [vmem:[#allocation8 + $0x68] sm:$0xff]  ;;  %v156_v47 = vld [vmem:[#allocation2] sm:$0xff] }
  0x9c   :  { %1085 = vmatprep.subr.bf16.mxu1 %v1476_v0  ;;  %v1077_v45 = vpack.c.bf16 %v172_v41, %v171_v40  ;;  %v1098_v46 = vpack.c.bf16 %v264_v44, %v263_v43  ;;  %v265_v48 = vld [vmem:[#allocation8 + $0x70] sm:$0xff]  ;;  %v266_v49 = vld [vmem:[#allocation8 + $0x78] sm:$0xff]  ;;  %v346_v51 = vld [vmem:[#allocation10 + $0x8] sm:$0xff] }
  0x9d   :  { %1063 = vmatpush3.bf16.msra.mxu0 %v1062_v14  ;;  %v1101_v50 = vpack.c.bf16 %v266_v49, %v265_v48  ;;  %v348_v52 = vld [vmem:[#allocation10 + $0x18] sm:$0xff]  ;;  %v345_v53 = vld [vmem:[#allocation10] sm:$0xff]  ;;  %v347_v55 = vld [vmem:[#allocation10 + $0x10] sm:$0xff] }
  0x9e   :  { %1064 = vmatprep.subr.bf16.mxu0 %v1476_v0  ;;  %v1103_v54 = vpack.c.bf16 %v348_v52, %v346_v51  ;;  %v350_v56 = vld [vmem:[#allocation10 + $0x28] sm:$0xff]  ;;  %v352_v57 = vld [vmem:[#allocation10 + $0x38] sm:$0xff]  ;;  %v1105_v58 = vpack.c.bf16 %v347_v55, %v345_v53  ;;  %v349_v60 = vld [vmem:[#allocation10 + $0x20] sm:$0xff] }
  0x9f   :  { %1087 = vmatpush3.bf16.msra.mxu1 %v1086_v24  ;;  %v1107_v59 = vpack.c.bf16 %v352_v57, %v350_v56  ;;  %v351_v61 = vld [vmem:[#allocation10 + $0x30] sm:$0xff]  ;;  %v354_v62 = vld [vmem:[#allocation10 + $0x48] sm:$0xff]  ;;  %v356_v63 = vld [vmem:[#allocation10 + $0x58] sm:$0xff] }
  0xa0   :  { %1088 = vmatprep.subr.bf16.mxu1 %v1476_v0  ;;  %v1109_v2 = vpack.c.bf16 %v351_v61, %v349_v60  ;;  %v1111_v3 = vpack.c.bf16 %v356_v63, %v354_v62  ;;  %v353_v4 = vld [vmem:[#allocation10 + $0x40] sm:$0xff]  ;;  %v355_v5 = vld [vmem:[#allocation10 + $0x50] sm:$0xff]  ;;  %v358_v6 = vld [vmem:[#allocation10 + $0x68] sm:$0xff] }
  0xa1   :  { %1066 = vmatpush3.bf16.msra.mxu0 %v1065_v21  ;;  %v360_v7 = vld [vmem:[#allocation10 + $0x78] sm:$0xff]  ;;  %v1113_v8 = vpack.c.bf16 %v355_v5, %v353_v4  ;;  %v357_v10 = vld [vmem:[#allocation10 + $0x60] sm:$0xff]  ;;  %v359_v11 = vld [vmem:[#allocation10 + $0x70] sm:$0xff] }
  0xa2   :  { %1067 = vmatprep.subr.bf16.mxu0 %v1476_v0  ;;  %v1115_v9 = vpack.c.bf16 %v360_v7, %v358_v6  ;;  %v362_v12 = vld [vmem:[#allocation10 + $0x88] sm:$0xff]  ;;  %v364_v13 = vld [vmem:[#allocation10 + $0x98] sm:$0xff]  ;;  %v1117_v14 = vpack.c.bf16 %v359_v11, %v357_v10  ;;  %v361_v16 = vld [vmem:[#allocation10 + $0x80] sm:$0xff] }
  0xa3   :  { %1090 = vmatpush3.bf16.msra.mxu1 %v1089_v30  ;;  %v1119_v15 = vpack.c.bf16 %v364_v13, %v362_v12  ;;  %v363_v17 = vld [vmem:[#allocation10 + $0x90] sm:$0xff]  ;;  %v366_v18 = vld [vmem:[#allocation10 + $0xa8] sm:$0xff]  ;;  %v368_v19 = vld [vmem:[#allocation10 + $0xb8] sm:$0xff] }
  0xa4   :  { %1091 = vmatprep.subr.bf16.mxu1 %v1476_v0  ;;  %v1121_v20 = vpack.c.bf16 %v363_v17, %v361_v16  ;;  %v1123_v21 = vpack.c.bf16 %v368_v19, %v366_v18  ;;  %v365_v22 = vld [vmem:[#allocation10 + $0xa0] sm:$0xff]  ;;  %v367_v23 = vld [vmem:[#allocation10 + $0xb0] sm:$0xff]  ;;  %v370_v24 = vld [vmem:[#allocation10 + $0xc8] sm:$0xff] }
  0xa5   :  { %1069 = vmatpush3.bf16.msra.mxu0 %v1068_v27  ;;  %v372_v25 = vld [vmem:[#allocation10 + $0xd8] sm:$0xff]  ;;  %v1125_v26 = vpack.c.bf16 %v367_v23, %v365_v22  ;;  %v369_v28 = vld [vmem:[#allocation10 + $0xc0] sm:$0xff]  ;;  %v371_v29 = vld [vmem:[#allocation10 + $0xd0] sm:$0xff] }
  0xa6   :  { %1070 = vmatprep.subr.bf16.mxu0 %v1476_v0  ;;  %v1127_v27 = vpack.c.bf16 %v372_v25, %v370_v24  ;;  %v1129_v30 = vpack.c.bf16 %v371_v29, %v369_v28  ;;  %v789_v31 = vld [vmem:[%s1775_s3] ss:$0 sm:$0xff]  ;;  %v376_v37 = vld [vmem:[#allocation10 + $0xf8] sm:$0xff]  ;;  %v467_v43 = vld [vmem:[#allocation11 + $0x8] sm:$0xff] }
  0xa7   :  { %1093 = vmatpush3.bf16.msra.mxu1 %v1092_v36  ;;  %v374_v36 = vld [vmem:[#allocation10 + $0xe8] sm:$0xff]  ;;  %v375_v40 = vld [vmem:[#allocation10 + $0xf0] sm:$0xff]  ;;  %v470_v53 = vld [vmem:[#allocation11 + $0x20] sm:$0xff] }
  0xa8   :  { %1094 = vmatprep.subr.bf16.mxu1 %v1476_v0  ;;  %v1131_v38 = vpack.c.bf16 %v376_v37, %v374_v36  ;;  %v468_v44 = vld [vmem:[#allocation11 + $0x10] sm:$0xff]  ;;  %v473_v57 = vld [vmem:[#allocation11 + $0x38] sm:$0xff]  ;;  %v475_v60 = vld [vmem:[#allocation11 + $0x48] sm:$0xff] }
  0xa9   :  { %1072 = vmatpush3.bf16.msra.mxu0 %v1071_v33  ;;  %v790_v48 = vld [vmem:[%s1777_s5] ss:$0 sm:$0xff]  ;;  %v477_v63 = vld [vmem:[#allocation11 + $0x58] sm:$0xff]  ;;  %v479_v4 = vld [vmem:[#allocation11 + $0x68] sm:$0xff] }
  0xaa   :  { %1073 = vmatprep.subr.bf16.mxu0 %v1476_v0  ;;  %v472_v56 = vld [vmem:[#allocation11 + $0x30] sm:$0xff]  ;;  %v481_v7 = vld [vmem:[#allocation11 + $0x78] sm:$0xff]  ;;  %v561_v10 = vld [vmem:[#allocation13 + $0x8] sm:$0xff] }
  0xab   :  { %1096 = vmatpush3.bf16.msra.mxu1 %v1095_v42  ;;  %v466_v42 = vld [vmem:[#allocation11] sm:$0xff]  ;;  %v476_v62 = vld [vmem:[#allocation11 + $0x50] sm:$0xff]  ;;  %v563_v13 = vld [vmem:[#allocation13 + $0x18] sm:$0xff] }
  0xac   :  { %1097 = vmatprep.subr.bf16.mxu1 %v1476_v0  ;;  %v480_v6 = vld [vmem:[#allocation11 + $0x70] sm:$0xff]  ;;  %v565_v16 = vld [vmem:[#allocation13 + $0x28] sm:$0xff]  ;;  %v567_v19 = vld [vmem:[#allocation13 + $0x38] sm:$0xff] }
  0xad   :  { %1075 = vmatpush3.bf16.msra.mxu0 %v1074_v39  ;;  %v373_v39 = vld [vmem:[#allocation10 + $0xe0] sm:$0xff]  ;;  %v562_v11 = vld [vmem:[#allocation13 + $0x10] sm:$0xff]  ;;  %v569_v22 = vld [vmem:[#allocation13 + $0x48] sm:$0xff] }
  0xae   :  { %1076 = vmatprep.subr.bf16.mxu0 %v1476_v0  ;;  %v1133_v41 = vpack.c.bf16 %v375_v40, %v373_v39  ;;  %v566_v18 = vld [vmem:[#allocation13 + $0x30] sm:$0xff]  ;;  %v571_v25 = vld [vmem:[#allocation13 + $0x58] sm:$0xff]  ;;  %v573_v28 = vld [vmem:[#allocation13 + $0x68] sm:$0xff] }
  0xaf   :  { %1099 = vmatpush3.bf16.msra.mxu1 %v1098_v46  ;;  %v469_v46 = vld [vmem:[#allocation11 + $0x18] sm:$0xff]  ;;  %v570_v24 = vld [vmem:[#allocation13 + $0x50] sm:$0xff] }
  0xb0   :  { %1100 = vmatprep.subr.bf16.mxu1 %v1476_v0 }
  0xb1   :  { %1078 = vmatpush3.bf16.msra.mxu0 %v1077_v45  ;;  %v1136_v45 = vpack.c.bf16 %v467_v43, %v466_v42  ;;  %v460_v43 = vld [vmem:[#allocation5] sm:$0xff] }
  0xb2   :  { %1104 = vmatprep.subr.bf16.mxu0 %v1103_v54  ;;  %v471_v54 = vld [vmem:[#allocation11 + $0x28] sm:$0xff] }
  0xb3   :  { %1102 = vmatpush3.bf16.msra.mxu1 %v1101_v50  ;;  %v1142_v55 = vpack.c.bf16 %v471_v54, %v470_v53  ;;  %v657_v54 = vld [vmem:[#allocation14 + $0x18] sm:$0xff] }
  0xb4   :  { %913 = vmatmul.mubr.f32.vlgmr.msra.gmra.mrb[0].mxu0 %v156_v47  ;;  %1135 = vmatprep.subr.bf16.mxu1 %v1476_v0  ;;  %v1139_v47 = vpack.c.bf16 %v469_v46, %v468_v44 }
  0xb5   :  { %453 = vmatprep.mubr.f32.mxu0 %v1478_v1  ;;  %1106 = vmatpush1.bf16.msra.mxu0 %v1105_v58  ;;  %v1145_v58 = vpack.c.bf16 %v473_v57, %v472_v56  ;;  %v658_v56 = vld [vmem:[#allocation14 + $0x20] sm:$0xff]  ;;  %v659_v57 = vld [vmem:[#allocation14 + $0x28] sm:$0xff] }
  0xb6   :  { %1108 = vmatprep.subr.bf16.mxu0 %v1107_v59  ;;  %v474_v59 = vld [vmem:[#allocation11 + $0x40] sm:$0xff] }
  0xb7   :  { %v1148_v61 = vpack.c.bf16 %v475_v60, %v474_v59  ;;  %v661_v59 = vld [vmem:[#allocation14 + $0x38] sm:$0xff] }
  0xb9   :  { %1110 = vmatpush1.bf16.msra.mxu0 %v1109_v2  ;;  %v1151_v2 = vpack.c.bf16 %v477_v63, %v476_v62  ;;  %v663_v62 = vld [vmem:[#allocation14 + $0x48] sm:$0xff] }
  0xba   :  { %1112 = vmatprep.subr.bf16.mxu0 %v1111_v3  ;;  %v478_v3 = vld [vmem:[#allocation11 + $0x60] sm:$0xff] }
  0xbb   :  { %v1154_v5 = vpack.c.bf16 %v479_v4, %v478_v3  ;;  %v665_v3 = vld [vmem:[#allocation14 + $0x58] sm:$0xff] }
  0xbd   :  { %1114 = vmatpush1.bf16.msra.mxu0 %v1113_v8  ;;  %v1157_v8 = vpack.c.bf16 %v481_v7, %v480_v6  ;;  %v667_v6 = vld [vmem:[#allocation14 + $0x68] sm:$0xff] }
  0xbe   :  { %1116 = vmatprep.subr.bf16.mxu0 %v1115_v9  ;;  %v560_v9 = vld [vmem:[#allocation13] sm:$0xff] }
  0xbf   :  { %v1160_v12 = vpack.c.bf16 %v561_v10, %v560_v9 }
  0xc1   :  { %1118 = vmatpush1.bf16.msra.mxu0 %v1117_v14  ;;  %v1163_v14 = vpack.c.bf16 %v563_v13, %v562_v11  ;;  %v668_v13 = vld [vmem:[#allocation14 + $0x70] sm:$0xff] }
  0xc2   :  { %1120 = vmatprep.subr.bf16.mxu0 %v1119_v15  ;;  %v564_v15 = vld [vmem:[#allocation13 + $0x20] sm:$0xff] }
  0xc3   :  { %v1166_v17 = vpack.c.bf16 %v565_v16, %v564_v15  ;;  %v792_v16 = vld [vmem:[%s1783_s11] ss:$0 sm:$0xff] }
  0xc5   :  { %1122 = vmatpush1.bf16.msra.mxu0 %v1121_v20  ;;  %v1169_v20 = vpack.c.bf16 %v567_v19, %v566_v18 }
  0xc6   :  { %1124 = vmatprep.subr.bf16.mxu0 %v1123_v21  ;;  %v568_v21 = vld [vmem:[#allocation13 + $0x40] sm:$0xff] }
  0xc7   :  { %v1172_v23 = vpack.c.bf16 %v569_v22, %v568_v21 }
  0xc9   :  { %1126 = vmatpush1.bf16.msra.mxu0 %v1125_v26  ;;  %v1175_v26 = vpack.c.bf16 %v571_v25, %v570_v24 }
  0xca   :  { %1128 = vmatprep.subr.bf16.mxu0 %v1127_v27  ;;  %v572_v27 = vld [vmem:[#allocation13 + $0x60] sm:$0xff] }
  0xcb   :  { %v1178_v29 = vpack.c.bf16 %v573_v28, %v572_v27 }
  0xcd   :  { %1130 = vmatpush1.bf16.msra.mxu0 %v1129_v30  ;;  %v379_v30 = vlaneseq }
  0xce   :  { %1132 = vmatprep.subr.bf16.mxu0 %v1131_v38 }
  0xd1   :  { %1134 = vmatpush1.bf16.msra.mxu0 %v1133_v41 }
  0xd2   :  { %1159 = vmatprep.subr.bf16.mxu0 %v1476_v0 }
 0x187   :  { %v246_v32 = vpop.f32.mrb[0].mxu0 }
 0x188   :  { %v247_v33 = vadd.f32 %v789_v31, %v246_v32  ;;  %v914_v34 = vpop.f32.mrb[1].mxu0  ;;  %v380_v31 = vshrl.u32 %v379_v30, 7 }
 0x18a   :  { %v250_v35 = vmax.f32 %v247_v33, 0.0  ;;  %v381_v32 = vsub.s32 0, %v380_v31  ;;  %v377_v33 = vld [vmem:[%s1779_s7] sm:$0x3]  ;;  %v385_v34 = vsub.s32 1, %v380_v31 }
 0x18c   :  { %948 = vmatmul.mubr.f32.vlgmr.msra.gmra.mrb[0].mxu1 %v250_v35  ;;  %v382_v35 = vrot.slane %v377_v33, %v381_v32  ;;  %v386_v36 = vrot.slane %v377_v33, %v385_v34 }
 0x18d   :  { %982 = vmatprep.mubr.msk.f32.mxu1 %vm1477_vm0, %v1478_v1  ;;  %1137 = vmatpush3.bf16.msra.mxu1 %v1136_v45 }
 0x18e   :  { %1138 = vmatprep.subr.bf16.mxu1 %v1476_v0 }
 0x191   :  { %1140 = vmatpush3.bf16.msra.mxu1 %v1139_v47  ;;  %v574_v47 = vld [vmem:[#allocation13 + $0x70] sm:$0xff] }
 0x192   :  { %1141 = vmatprep.subr.bf16.mxu1 %v1476_v0 }
 0x195   :  { %1143 = vmatpush3.bf16.msra.mxu1 %v1142_v55 }
 0x196   :  { %1144 = vmatprep.subr.bf16.mxu1 %v1476_v0 }
 0x199   :  { %1146 = vmatpush3.bf16.msra.mxu1 %v1145_v58  ;;  %v1190_v58 = vpack.c.bf16 %v659_v57, %v658_v56 }
 0x19a   :  { %1147 = vmatprep.subr.bf16.mxu1 %v1476_v0 }
 0x19d   :  { %1149 = vmatpush3.bf16.msra.mxu1 %v1148_v61  ;;  %v662_v61 = vld [vmem:[#allocation14 + $0x40] sm:$0xff] }
 0x19e   :  { %1150 = vmatprep.subr.bf16.mxu1 %v1476_v0  ;;  %v1196_v63 = vpack.c.bf16 %v663_v62, %v662_v61 }
 0x1a1   :  { %1152 = vmatpush3.bf16.msra.mxu1 %v1151_v2  ;;  %v664_v2 = vld [vmem:[#allocation14 + $0x50] sm:$0xff] }
 0x1a2   :  { %1153 = vmatprep.subr.bf16.mxu1 %v1476_v0  ;;  %v1199_v4 = vpack.c.bf16 %v665_v3, %v664_v2 }
 0x1a5   :  { %1155 = vmatpush3.bf16.msra.mxu1 %v1154_v5  ;;  %v666_v5 = vld [vmem:[#allocation14 + $0x60] sm:$0xff] }
 0x1a6   :  { %1156 = vmatprep.subr.bf16.mxu1 %v1476_v0  ;;  %v1202_v7 = vpack.c.bf16 %v667_v6, %v666_v5 }
 0x1a9   :  { %1158 = vmatpush3.bf16.msra.mxu1 %v1157_v8  ;;  %v791_v8 = vld [vmem:[%s1781_s9] ss:$0 sm:$0xff]  ;;  %s772_s9 = sshll.u32 %s1479_s25, 4  ;;  %s773_s9 = int_to_ptr.vmem [resolvable:$true] %s772_s9 }
 0x1aa   :  { %1183 = vmatprep.subr.bf16.mxu1 %v1476_v0  ;;  %s1406_s4 = scalar_lea.vmem %s773_s9, 256  ;;  %p1411_p9 = scmp.lt.s32.totalorder %s773_s9, %s773_s9 }
 0x1ab   :  { %p1407_p8 = scmp.ne.s32.totalorder %s773_s9, %s1406_s4  ;;  %p1412_p10 = scmp.lt.s32.totalorder %s1406_s4, %s1406_s4 }
 0x1ad   :  { %p1413_p11 = por %p1412_p10, %p1411_p9 }
 0x1af   :  { %p1414_p12 = pnand %p1413_p11, %p1407_p8 }
 0x25f   :  { %v340_v49 = vpop.f32.mrb[0].mxu1 }
 0x260   :  { %v341_v50 = vadd.f32 %v790_v48, %v340_v49  ;;  %v949_v51 = vpop.f32.mrb[1].mxu1  ;;  %v575_v48 = vld [vmem:[#allocation13 + $0x78] sm:$0xff] }
 0x261   :  { %v1181_v49 = vpack.c.bf16 %v575_v48, %v574_v47  ;;  %v655_v51 = vld [vmem:[#allocation14 + $0x8] sm:$0xff] }
 0x262   :  { %v344_v52 = vmax.f32 %v341_v50, 0.0  ;;  %v654_v50 = vld [vmem:[#allocation14] sm:$0xff] }
 0x263   :  { %v1184_v53 = vpack.c.bf16 %v655_v51, %v654_v50 }
 0x264   :  { %454 = vmatmul.mubr.f32.vlgmr.msra.gmra.mrb[2].mxu0 %v344_v52  ;;  %v656_v52 = vld [vmem:[#allocation14 + $0x10] sm:$0xff] }
 0x265   :  { %1017 = vmatprep.mubr.msk.f32.mxu0 %vm1477_vm0, %v1478_v1  ;;  %1161 = vmatpush3.bf16.msra.mxu0 %v1160_v12  ;;  %v1187_v55 = vpack.c.bf16 %v657_v54, %v656_v52 }
 0x266   :  { %1162 = vmatprep.subr.bf16.mxu0 %v1476_v0 }
 0x269   :  { %1164 = vmatpush3.bf16.msra.mxu0 %v1163_v14  ;;  %v669_v14 = vld [vmem:[#allocation14 + $0x78] sm:$0xff] }
 0x26a   :  { %1165 = vmatprep.subr.bf16.mxu0 %v1476_v0  ;;  %v1205_v15 = vpack.c.bf16 %v669_v14, %v668_v13 }
 0x26d   :  { %1167 = vmatpush3.bf16.msra.mxu0 %v1166_v17 }
 0x26e   :  { %1168 = vmatprep.subr.bf16.mxu0 %v1476_v0 }
 0x271   :  { %1170 = vmatpush3.bf16.msra.mxu0 %v1169_v20 }
 0x272   :  { %1171 = vmatprep.subr.bf16.mxu0 %v1476_v0 }
 0x275   :  { %1173 = vmatpush3.bf16.msra.mxu0 %v1172_v23 }
 0x276   :  { %1174 = vmatprep.subr.bf16.mxu0 %v1476_v0 }
 0x279   :  { %1176 = vmatpush3.bf16.msra.mxu0 %v1175_v26 }
 0x27a   :  { %1177 = vmatprep.subr.bf16.mxu0 %v1476_v0 }
 0x27d   :  { %1179 = vmatpush3.bf16.msra.mxu0 %v1178_v29 }
 0x27e   :  { %1180 = vmatprep.subr.bf16.mxu0 %v1476_v0 }
 0x281   :  { %1182 = vmatpush3.bf16.msra.mxu0 %v1181_v49 }
 0x337   :  { %v455_v37 = vpop.f32.mrb[2].mxu0 }
 0x338   :  { %v456_v38 = vadd.f32 %v455_v37, %v382_v35  ;;  %v457_v39 = vpop.f32.mrb[3].mxu0 }
 0x339   :  { %v458_v40 = vadd.f32 %v457_v39, %v386_v36 }
 0x33a   :  { %754 = vst [vmem:[#allocation17] sm:$0xff] %v456_v38 }
 0x33b   :  { %v461_v41 = vmul.f32 0.5, %v458_v40  ;;  %755 = vst [vmem:[#allocation17 + $0x8] sm:$0xff] %v458_v40 }
 0x33d   :  { %v462_v42 = vmul.f32 1.442695, %v461_v41 }
 0x33f   :  { %1224 = vpow2.f32 %v462_v42 }
 0x349   :  { %v1225_v44 = vpop.eup %1224 }
 0x34a   :  { %v464_v45 = vmul.f32 %v1225_v44, %v460_v43 }
 0x34c   :  { %v465_v46 = vadd.f32 %v464_v45, %v456_v38 }
 0x34e   :  { %983 = vmatmul.mubr.f32.vlgmr.msra.gmra.mrb[2].mxu1 %v465_v46 }
 0x34f   :  { %1052 = vmatprep.mubr.msk.f32.mxu1 %vm1477_vm0, %v1478_v1  ;;  %1185 = vmatpush3.bf16.msra.mxu1 %v1184_v53  ;;  %v660_v1 = vld [vmem:[#allocation14 + $0x30] sm:$0xff] }
 0x350   :  { %1186 = vmatprep.subr.bf16.mxu1 %v1476_v0  ;;  %v1193_v60 = vpack.c.bf16 %v661_v59, %v660_v1 }
 0x353   :  { %1188 = vmatpush3.bf16.msra.mxu1 %v1187_v55 }
 0x354   :  { %1189 = vmatprep.subr.bf16.mxu1 %v1476_v0 }
 0x357   :  { %1191 = vmatpush3.bf16.msra.mxu1 %v1190_v58 }
 0x358   :  { %1192 = vmatprep.subr.bf16.mxu1 %v1476_v0 }
 0x35b   :  { %1194 = vmatpush3.bf16.msra.mxu1 %v1193_v60 }
 0x35c   :  { %1195 = vmatprep.subr.bf16.mxu1 %v1476_v0 }
 0x35f   :  { %1197 = vmatpush3.bf16.msra.mxu1 %v1196_v63 }
 0x360   :  { %1198 = vmatprep.subr.bf16.mxu1 %v1476_v0 }
 0x363   :  { %1200 = vmatpush3.bf16.msra.mxu1 %v1199_v4 }
 0x364   :  { %1201 = vmatprep.subr.bf16.mxu1 %v1476_v0 }
 0x367   :  { %1203 = vmatpush3.bf16.msra.mxu1 %v1202_v7 }
 0x368   :  { %1204 = vmatprep.subr.bf16.mxu1 %v1476_v0 }
 0x36b   :  { %1206 = vmatpush3.bf16.msra.mxu1 %v1205_v15 }
 0x421   :  { %v555_v9 = vpop.f32.mrb[2].mxu1 }
 0x422   :  { %v556_v10 = vadd.f32 %v791_v8, %v555_v9  ;;  %v984_v11 = vpop.f32.mrb[3].mxu1 }
 0x424   :  { %v559_v12 = vmax.f32 %v556_v10, 0.0 }
 0x426   :  { %1018 = vmatmul.mubr.f32.vlgmr.msra.gmra.mrb[4].mxu0 %v559_v12 }
 0x4f9   :  { %v649_v17 = vpop.f32.mrb[4].mxu0 }
 0x4fa   :  { %v650_v18 = vadd.f32 %v792_v16, %v649_v17  ;;  %v1019_v0 = vpop.f32.mrb[5].mxu0 }
 0x4fc   :  { %v653_v19 = vmax.f32 %v650_v18, 0.0 }
 0x4fe   :  { %1053 = vmatmul.mubr.f32.vlgmr.msra.gmra.mrb[4].mxu1 %v653_v19 }
 0x4ff   :  { %1417 = shalt.err (!%p1414_p12)
}
 0x500   :  { %s1418_s23 = scalar_lea.hbm %s1787_s15, 256 }
 0x501   :  { %p1419_p13 = scmp.ne.s32.totalorder %s1787_s15, %s1418_s23  ;;  %p1422_p0 = scmp.lt.u32.totalorder %s1418_s23, %s1787_s15 }
 0x503   :  { %p1424_p1 = pnand %p1422_p0, %p1419_p13 }
 0x505   :  { %1427 = shalt.err (!%p1424_p1)
}
 0x506   :  { %775 = dma.vmem_to_hbm [thread:$0]  %s773_s9, 256, %s1787_s15, [#allocation18]   ;;  %v793_v20 = vld [vmem:[%s1785_s13] ss:$0 sm:$0xff] }
 0x507   :  { %s1480_s0 = smov [#allocation16]  }
 0x508   :  { %s762_s22 = sshll.u32 %s1480_s0, 4  ;;  %s763_s22 = int_to_ptr.vmem [resolvable:$true] %s762_s22 }
 0x509   :  { %s1428_s10 = scalar_lea.vmem %s763_s22, 128  ;;  %p1433_p3 = scmp.lt.s32.totalorder %s763_s22, %s763_s22 }
 0x50a   :  { %p1429_p2 = scmp.ne.s32.totalorder %s763_s22, %s1428_s10  ;;  %p1434_p4 = scmp.lt.s32.totalorder %s1428_s10, %s1428_s10 }
 0x50c   :  { %p1435_p5 = por %p1434_p4, %p1433_p3 }
 0x50e   :  { %p1436_p6 = pnand %p1435_p5, %p1429_p2 }
 0x5d1   :  { %v743_v21 = vpop.f32.mrb[4].mxu1 }
 0x5d2   :  { %v744_v22 = vadd.f32 %v793_v20, %v743_v21  ;;  %v1054_v23 = vpop.f32.mrb[5].mxu1 }
 0x5d4   :  { %v794_v24 = vmul.f32 -1.442695, %v744_v22 }
 0x5d6   :  { %1226 = vpow2.f32 %v794_v24 }
 0x5e0   :  { %v1227_v25 = vpop.eup %1226 }
 0x5e1   :  { %v750_v26 = vadd.f32 1.0, %v1227_v25 }
 0x5e3   :  { %1228 = vrcp.f32 %v750_v26 }
 0x5ed   :  { %v1229_v27 = vpop.eup %1228 }
 0x5ee   :  { %753 = vst [vmem:[#allocation16] sm:$0xff] %v1229_v27 }
 0x5ef   :  { %1439 = shalt.err (!%p1436_p6)
}
 0x5f0   :  { %s1440_s21 = scalar_lea.hbm %s1786_s14, 128 }
 0x5f1   :  { %p1441_p7 = scmp.ne.s32.totalorder %s1786_s14, %s1440_s21  ;;  %p1444_p8 = scmp.lt.u32.totalorder %s1440_s21, %s1786_s14 }
 0x5f3   :  { %p1446_p9 = pnand %p1444_p8, %p1441_p7 }
 0x5f5   :  { %1449 = shalt.err (!%p1446_p9)
}
 0x5f6   :  { %765 = dma.vmem_to_hbm [thread:$0]  %s763_s22, 128, %s1786_s14, [#allocation4]  }
 0x5f7   :  { %1460 = dma.done.wait [#allocation4], 128  }
 0x5f8   :  { %1461 = vsyncadd [#allocation4], 4294967168 }
 0x5f9   :  { %1462 = dma.done.wait [#allocation18], 256  }
 0x5fa   :  { %1463 = vsyncadd [#allocation18], 4294967040 }
 0x5fb   :  { %782 = vsyncpa [#allocation3], 1 }
 0x5fc   :  { %783 = vsyncpa [#allocation6], 1 }
 0x5fd   :  { %784 = vsyncpa [#allocation9], 1 }
 0x5fe   :  { %785 = vsyncpa [#allocation12], 1 }
 0x5ff   :  { %786 = vsyncpa [#allocation15], 1 }
 0x600   :  { %787 = vsyncpa [#allocation4], 1 }
 0x601   :  { %788 = vsyncpa [#allocation18], 1 }

// kernel: tpu_custom_call.1
= control target key start
LH: loop header
LB: loop body
LE: loop exit
PB: predicated region body
PF: predicated region fallthrough
CT: control target
= control target key end

     0   :  { %21 = vsyncpa [#allocation3], 0  ;;  %s1772_s0 = inlined_call_operand.hbm [shape: f32[8,128], index: 0, kind: input, shape index: {}]   ;;  %s1773_s1 = inlined_call_operand.hbm [shape: f32[8,128], index: 1, kind: input, shape index: {}]   ;;  %s1774_s2 = inlined_call_operand.hbm [shape: f32[128,128], index: 2, kind: input, shape index: {}]   ;;  %s1775_s3 = inlined_call_operand.vmem [shape: f32[1,128], index: 3, kind: input, shape index: {}]   ;;  %s1776_s4 = inlined_call_operand.hbm [shape: f32[128,128], index: 4, kind: input, shape index: {}]   ;;  %s1777_s5 = inlined_call_operand.vmem [shape: f32[1,128], index: 5, kind: input, shape index: {}]   ;;  %s1778_s6 = inlined_call_operand.hbm [shape: f32[128,256], index: 6, kind: input, shape index: {}]   ;;  %s1779_s7 = inlined_call_operand.vmem [shape: f32[1,256], index: 7, kind: input, shape index: {}]   ;;  %s1780_s8 = inlined_call_operand.hbm [shape: f32[128,128], index: 8, kind: input, shape index: {}]   ;;  %s1781_s9 = inlined_call_operand.vmem [shape: f32[1,128], index: 9, kind: input, shape index: {}]   ;;  %s1782_s10 = inlined_call_operand.hbm [shape: f32[128,128], index: 10, kind: input, shape index: {}]   ;;  %s1783_s11 = inlined_call_operand.vmem [shape: f32[1,128], index: 11, kind: input, shape index: {}]   ;;  %s1784_s12 = inlined_call_operand.hbm [shape: f32[128,128], index: 12, kind: input, shape index: {}]   ;;  %s1785_s13 = inlined_call_operand.vmem [shape: f32[1,128], index: 13, kind: input, shape index: {}]   ;;  %s1786_s14 = inlined_call_operand.hbm [shape: f32[8,128], index: 14, kind: output, shape index: {0}]   ;;  %s1787_s15 = inlined_call_operand.hbm [shape: f32[8,256], index: 15, kind: output, shape index: {1}]  }
   0x1   :  { %22 = vsyncpa [#allocation6], 0 }
   0x2   :  { %23 = vsyncpa [#allocation9], 0 }
   0x3   :  { %24 = vsyncpa [#allocation12], 0 }
   0x4   :  { %25 = vsyncpa [#allocation15], 0 }
   0x5   :  { %26 = vsyncpa [#allocation4], 0 }
   0x6   :  { %27 = vsyncpa [#allocation18], 0  ;;  %s1464_s18 = smov [#allocation5]   ;;  %s1230_s22 = scalar_lea.hbm %s1773_s1, 128 }
   0x7   :  { %s44_s19 = sshll.u32 %s1464_s18, 4  ;;  %p1231_p0 = scmp.ne.s32.totalorder %s1773_s1, %s1230_s22  ;;  %s45_s19 = int_to_ptr.vmem [resolvable:$true] %s44_s19 }
   0x8   :  { %p1234_p1 = scmp.lt.u32.totalorder %s1230_s22, %s1773_s1 }
   0xa   :  { %p1236_p2 = pnand %p1234_p1, %p1231_p0 }
   0xc   :  { %1239 = shalt.err (!%p1236_p2)
}
   0xd   :  { %s1240_s27 = scalar_lea.vmem %s45_s19, 128  ;;  %p1245_p4 = scmp.lt.s32.totalorder %s45_s19, %s45_s19 }
   0xe   :  { %p1241_p3 = scmp.ne.s32.totalorder %s45_s19, %s1240_s27  ;;  %p1246_p5 = scmp.lt.s32.totalorder %s1240_s27, %s1240_s27 }
  0x10   :  { %p1247_p6 = por %p1246_p5, %p1245_p4 }
  0x12   :  { %p1248_p7 = pnand %p1247_p6, %p1241_p3 }
  0x14   :  { %1251 = shalt.err (!%p1248_p7)
}
  0x15   :  { %47 = dma.hbm_to_vmem [thread:$0]  %s1773_s1, 128, %s45_s19, [#allocation6]  }
  0x16   :  { %s1465_s30 = smov [#allocation8]   ;;  %s1466_s17 = smov [#allocation11]  }
  0x17   :  { %s67_s16 = sshll.u32 %s1465_s30, 4  ;;  %s95_s18 = sshll.u32 %s1466_s17, 4  ;;  %s68_s16 = int_to_ptr.vmem [resolvable:$true] %s67_s16  ;;  %s96_s18 = int_to_ptr.vmem [resolvable:$true] %s95_s18 }
  0x18   :  { %s1252_s22 = scalar_lea.hbm %s1776_s4, 2048 }
  0x19   :  { %p1253_p8 = scmp.ne.s32.totalorder %s1776_s4, %s1252_s22  ;;  %p1256_p9 = scmp.lt.u32.totalorder %s1252_s22, %s1776_s4 }
  0x1b   :  { %p1258_p10 = pnand %p1256_p9, %p1253_p8 }
  0x1d   :  { %1261 = shalt.err (!%p1258_p10)
}
  0x1e   :  { %s1262_s1 = scalar_lea.vmem %s68_s16, 2048  ;;  %p1267_p12 = scmp.lt.s32.totalorder %s68_s16, %s68_s16 }
  0x1f   :  { %p1263_p11 = scmp.ne.s32.totalorder %s68_s16, %s1262_s1  ;;  %p1268_p13 = scmp.lt.s32.totalorder %s1262_s1, %s1262_s1 }
  0x21   :  { %p1269_p0 = por %p1268_p13, %p1267_p12 }
  0x23   :  { %p1270_p1 = pnand %p1269_p0, %p1263_p11 }
  0x25   :  { %1273 = shalt.err (!%p1270_p1)
}
  0x26   :  { %s1467_s19 = smov 128   ;;  %s1468_s27 = smov 8  }
  0x27   :  { %73 = dma.hbm_to_vmem [thread:$0]  %s1776_s4, 2048, %s68_s16, [#allocation9], %s1467_s19, %s1467_s19, %s1468_s27  }
  0x28   :  { %s1274_s20 = scalar_lea.hbm %s1780_s8, 2048 }
  0x29   :  { %p1275_p2 = scmp.ne.s32.totalorder %s1780_s8, %s1274_s20  ;;  %p1278_p3 = scmp.lt.u32.totalorder %s1274_s20, %s1780_s8 }
  0x2b   :  { %p1280_p4 = pnand %p1278_p3, %p1275_p2 }
  0x2d   :  { %1283 = shalt.err (!%p1280_p4)
}
  0x2e   :  { %s1284_s25 = scalar_lea.vmem %s96_s18, 2048  ;;  %p1289_p6 = scmp.lt.s32.totalorder %s96_s18, %s96_s18 }
  0x2f   :  { %p1285_p5 = scmp.ne.s32.totalorder %s96_s18, %s1284_s25  ;;  %p1290_p7 = scmp.lt.s32.totalorder %s1284_s25, %s1284_s25 }
  0x31   :  { %p1291_p8 = por %p1290_p7, %p1289_p6 }
  0x33   :  { %p1292_p9 = pnand %p1291_p8, %p1285_p5 }
  0x35   :  { %1295 = shalt.err (!%p1292_p9)
}
  0x36   :  { %101 = dma.hbm_to_vmem [thread:$0]  %s1780_s8, 2048, %s96_s18, [#allocation12], %s1467_s19, %s1467_s19, %s1468_s27  }
  0x37   :  { %s1469_s26 = smov [#allocation2]   ;;  %s1470_s28 = smov [#allocation7]  }
  0x38   :  { %s34_s1 = sshll.u32 %s1469_s26, 4  ;;  %s53_s29 = sshll.u32 %s1470_s28, 4  ;;  %s35_s1 = int_to_ptr.vmem [resolvable:$true] %s34_s1  ;;  %s54_s29 = int_to_ptr.vmem [resolvable:$true] %s53_s29 }
  0x39   :  { %s1296_s20 = scalar_lea.hbm %s1772_s0, 128 }
  0x3a   :  { %p1297_p10 = scmp.ne.s32.totalorder %s1772_s0, %s1296_s20  ;;  %p1300_p11 = scmp.lt.u32.totalorder %s1296_s20, %s1772_s0 }
  0x3c   :  { %p1302_p12 = pnand %p1300_p11, %p1297_p10 }
  0x3e   :  { %1305 = shalt.err (!%p1302_p12)
}
  0x3f   :  { %s1306_s8 = scalar_lea.vmem %s35_s1, 128  ;;  %p1311_p0 = scmp.lt.s32.totalorder %s35_s1, %s35_s1 }
  0x40   :  { %p1307_p13 = scmp.ne.s32.totalorder %s35_s1, %s1306_s8  ;;  %p1312_p1 = scmp.lt.s32.totalorder %s1306_s8, %s1306_s8 }
  0x42   :  { %p1313_p2 = por %p1312_p1, %p1311_p0 }
  0x44   :  { %p1314_p3 = pnand %p1313_p2, %p1307_p13 }
  0x46   :  { %1317 = shalt.err (!%p1314_p3)
}
  0x47   :  { %37 = dma.hbm_to_vmem [thread:$0]  %s1772_s0, 128, %s35_s1, [#allocation3]  }
  0x48   :  { %s1318_s26 = scalar_lea.hbm %s1774_s2, 2048 }
  0x49   :  { %p1319_p4 = scmp.ne.s32.totalorder %s1774_s2, %s1318_s26  ;;  %p1322_p5 = scmp.lt.u32.totalorder %s1318_s26, %s1774_s2 }
  0x4b   :  { %p1324_p6 = pnand %p1322_p5, %p1319_p4 }
  0x4d   :  { %1327 = shalt.err (!%p1324_p6)
}
  0x4e   :  { %s1328_s21 = scalar_lea.vmem %s54_s29, 2048  ;;  %p1333_p8 = scmp.lt.s32.totalorder %s54_s29, %s54_s29 }
  0x4f   :  { %p1329_p7 = scmp.ne.s32.totalorder %s54_s29, %s1328_s21  ;;  %p1334_p9 = scmp.lt.s32.totalorder %s1328_s21, %s1328_s21 }
  0x51   :  { %p1335_p10 = por %p1334_p9, %p1333_p8 }
  0x53   :  { %p1336_p11 = pnand %p1335_p10, %p1329_p7 }
  0x55   :  { %1339 = shalt.err (!%p1336_p11)
}
  0x56   :  { %59 = dma.hbm_to_vmem [thread:$0]  %s1774_s2, 2048, %s54_s29, [#allocation6], %s1467_s19, %s1467_s19, %s1468_s27  }
  0x57   :  { %s1471_s22 = smov [#allocation10]   ;;  %s1340_s18 = scalar_lea.hbm %s1778_s6, 4096 }
  0x58   :  { %s81_s23 = sshll.u32 %s1471_s22, 4  ;;  %p1341_p12 = scmp.ne.s32.totalorder %s1778_s6, %s1340_s18  ;;  %s82_s23 = int_to_ptr.vmem [resolvable:$true] %s81_s23 }
  0x59   :  { %p1344_p13 = scmp.lt.u32.totalorder %s1340_s18, %s1778_s6 }
  0x5b   :  { %p1346_p0 = pnand %p1344_p13, %p1341_p12 }
  0x5d   :  { %1349 = shalt.err (!%p1346_p0)
}
  0x5e   :  { %s1350_s28 = scalar_lea.vmem %s82_s23, 4096  ;;  %p1355_p2 = scmp.lt.s32.totalorder %s82_s23, %s82_s23 }
  0x5f   :  { %p1351_p1 = scmp.ne.s32.totalorder %s82_s23, %s1350_s28  ;;  %p1356_p3 = scmp.lt.s32.totalorder %s1350_s28, %s1350_s28 }
  0x61   :  { %p1357_p4 = por %p1356_p3, %p1355_p2 }
  0x63   :  { %p1358_p5 = pnand %p1357_p4, %p1351_p1 }
  0x65   :  { %1361 = shalt.err (!%p1358_p5)
}
  0x66   :  { %s1472_s2 = smov 256   ;;  %s1473_s29 = smov 16  }
  0x67   :  { %87 = dma.hbm_to_vmem [thread:$0]  %s1778_s6, 4096, %s82_s23, [#allocation9], %s1472_s2, %s1472_s2, %s1473_s29  }
  0x68   :  { %s1474_s20 = smov [#allocation13]   ;;  %s1475_s0 = smov [#allocation14]  }
  0x69   :  { %s109_s21 = sshll.u32 %s1474_s20, 4  ;;  %s123_s1 = sshll.u32 %s1475_s0, 4  ;;  %s110_s21 = int_to_ptr.vmem [resolvable:$true] %s109_s21  ;;  %s1642_s1 = int_to_ptr.vmem [resolvable:$true] %s123_s1 }
  0x6a   :  { %s1362_s8 = scalar_lea.hbm %s1782_s10, 2048 }
  0x6b   :  { %p1363_p6 = scmp.ne.s32.totalorder %s1782_s10, %s1362_s8  ;;  %p1366_p7 = scmp.lt.u32.totalorder %s1362_s8, %s1782_s10 }
  0x6d   :  { %p1368_p8 = pnand %p1366_p7, %p1363_p6 }
  0x6f   :  { %1371 = shalt.err (!%p1368_p8)
}
  0x70   :  { %s1372_s6 = scalar_lea.vmem %s110_s21, 2048  ;;  %p1377_p10 = scmp.lt.s32.totalorder %s110_s21, %s110_s21 }
  0x71   :  { %p1373_p9 = scmp.ne.s32.totalorder %s110_s21, %s1372_s6  ;;  %p1378_p11 = scmp.lt.s32.totalorder %s1372_s6, %s1372_s6 }
  0x73   :  { %p1379_p12 = por %p1378_p11, %p1377_p10 }
  0x75   :  { %p1380_p13 = pnand %p1379_p12, %p1373_p9 }
  0x77   :  { %1383 = shalt.err (!%p1380_p13)
}
  0x78   :  { %115 = dma.hbm_to_vmem [thread:$0]  %s1782_s10, 2048, %s110_s21, [#allocation12], %s1467_s19, %s1467_s19, %s1468_s27  }
  0x79   :  { %s1384_s29 = scalar_lea.hbm %s1784_s12, 2048 }
  0x7a   :  { %p1385_p0 = scmp.ne.s32.totalorder %s1784_s12, %s1384_s29  ;;  %p1388_p1 = scmp.lt.u32.totalorder %s1384_s29, %s1784_s12 }
  0x7c   :  { %p1390_p2 = pnand %p1388_p1, %p1385_p0 }
  0x7e   :  { %1393 = shalt.err (!%p1390_p2)
}
  0x7f   :  { %s1394_s22 = scalar_lea.vmem %s1642_s1, 2048  ;;  %p1399_p4 = scmp.lt.s32.totalorder %s1642_s1, %s1642_s1 }
  0x80   :  { %p1395_p3 = scmp.ne.s32.totalorder %s1642_s1, %s1394_s22  ;;  %p1400_p5 = scmp.lt.s32.totalorder %s1394_s22, %s1394_s22 }
  0x82   :  { %p1401_p6 = por %p1400_p5, %p1399_p4 }
  0x84   :  { %p1402_p7 = pnand %p1401_p6, %p1395_p3 }
  0x86   :  { %1405 = shalt.err (!%p1402_p7)
}
  0x87   :  { %129 = dma.hbm_to_vmem [thread:$0]  %s1784_s12, 2048, %s1642_s1, [#allocation15], %s1467_s19, %s1467_s19, %s1468_s27  }
  0x88   :  { %1450 = dma.done.wait [#allocation3], 128  }
  0x89   :  { %1451 = vsyncadd [#allocation3], 4294967168 }
  0x8a   :  { %1452 = dma.done.wait [#allocation6], 2176  }
  0x8b   :  { %1453 = vsyncadd [#allocation6], 4294965120 }
  0x8c   :  { %1454 = dma.done.wait [#allocation9], 6144  }
  0x8d   :  { %1455 = vsyncadd [#allocation9], 4294961152 }
  0x8e   :  { %1456 = dma.done.wait [#allocation12], 4096  }
  0x8f   :  { %1457 = vsyncadd [#allocation12], 4294963200 }
  0x90   :  { %1458 = dma.done.wait [#allocation15], 2048  }
  0x91   :  { %1459 = vsyncadd [#allocation15], 4294965248  ;;  %v1476_v0 = vmov 0.0|0.0   ;;  %vm1477_vm0 = vmmov 0   ;;  %v1478_v1 = vmov 0.0   ;;  %v157_v2 = vld [vmem:[#allocation7] sm:$0xff] }
  0x92   :  { %1055 = vmatprep.subr.bf16.mxu0 %v1476_v0  ;;  %912 = vmatprep.mubr.msk.f32.mxu0 %vm1477_vm0, %v1478_v1  ;;  %v158_v3 = vld [vmem:[#allocation7 + $0x8] sm:$0xff]  ;;  %v159_v4 = vld [vmem:[#allocation7 + $0x10] sm:$0xff]  ;;  %v160_v6 = vld [vmem:[#allocation7 + $0x18] sm:$0xff]  ;;  %s1479_s25 = smov [#allocation17]  }
  0x93   :  { %1079 = vmatprep.subr.bf16.mxu1 %v1476_v0  ;;  %947 = vmatprep.mubr.msk.f32.mxu1 %vm1477_vm0, %v1478_v1  ;;  %v1056_v5 = vpack.c.bf16 %v158_v3, %v157_v2  ;;  %v1059_v7 = vpack.c.bf16 %v160_v6, %v159_v4  ;;  %v161_v8 = vld [vmem:[#allocation7 + $0x20] sm:$0xff]  ;;  %v162_v9 = vld [vmem:[#allocation7 + $0x28] sm:$0xff]  ;;  %v253_v12 = vld [vmem:[#allocation8 + $0x10] sm:$0xff] }
  0x94   :  { %v251_v10 = vld [vmem:[#allocation8] sm:$0xff]  ;;  %v252_v11 = vld [vmem:[#allocation8 + $0x8] sm:$0xff]  ;;  %v254_v13 = vld [vmem:[#allocation8 + $0x18] sm:$0xff]  ;;  %v1062_v14 = vpack.c.bf16 %v162_v9, %v161_v8 }
  0x95   :  { %1057 = vmatpush3.bf16.msra.mxu0 %v1056_v5  ;;  %v1080_v15 = vpack.c.bf16 %v252_v11, %v251_v10  ;;  %v163_v16 = vld [vmem:[#allocation7 + $0x30] sm:$0xff]  ;;  %v164_v17 = vld [vmem:[#allocation7 + $0x38] sm:$0xff]  ;;  %v1083_v18 = vpack.c.bf16 %v254_v13, %v253_v12  ;;  %v255_v19 = vld [vmem:[#allocation8 + $0x20] sm:$0xff] }
  0x96   :  { %1058 = vmatprep.subr.bf16.mxu0 %v1476_v0  ;;  %v256_v20 = vld [vmem:[#allocation8 + $0x28] sm:$0xff]  ;;  %v1065_v21 = vpack.c.bf16 %v164_v17, %v163_v16  ;;  %v165_v22 = vld [vmem:[#allocation7 + $0x40] sm:$0xff]  ;;  %v257_v25 = vld [vmem:[#allocation8 + $0x30] sm:$0xff] }
  0x97   :  { %1081 = vmatpush3.bf16.msra.mxu1 %v1080_v15  ;;  %v166_v23 = vld [vmem:[#allocation7 + $0x48] sm:$0xff]  ;;  %v1086_v24 = vpack.c.bf16 %v256_v20, %v255_v19  ;;  %v258_v26 = vld [vmem:[#allocation8 + $0x38] sm:$0xff]  ;;  %v167_v28 = vld [vmem:[#allocation7 + $0x50] sm:$0xff] }
  0x98   :  { %1082 = vmatprep.subr.bf16.mxu1 %v1476_v0  ;;  %v1068_v27 = vpack.c.bf16 %v166_v23, %v165_v22  ;;  %v168_v29 = vld [vmem:[#allocation7 + $0x58] sm:$0xff]  ;;  %v1089_v30 = vpack.c.bf16 %v258_v26, %v257_v25  ;;  %v259_v31 = vld [vmem:[#allocation8 + $0x40] sm:$0xff]  ;;  %v260_v32 = vld [vmem:[#allocation8 + $0x48] sm:$0xff] }
  0x99   :  { %1060 = vmatpush3.bf16.msra.mxu0 %v1059_v7  ;;  %v1071_v33 = vpack.c.bf16 %v168_v29, %v167_v28  ;;  %v169_v34 = vld [vmem:[#allocation7 + $0x60] sm:$0xff]  ;;  %v170_v35 = vld [vmem:[#allocation7 + $0x68] sm:$0xff]  ;;  %v1092_v36 = vpack.c.bf16 %v260_v32, %v259_v31  ;;  %v261_v37 = vld [vmem:[#allocation8 + $0x50] sm:$0xff] }
  0x9a   :  { %1061 = vmatprep.subr.bf16.mxu0 %v1476_v0  ;;  %v262_v38 = vld [vmem:[#allocation8 + $0x58] sm:$0xff]  ;;  %v1074_v39 = vpack.c.bf16 %v170_v35, %v169_v34  ;;  %v171_v40 = vld [vmem:[#allocation7 + $0x70] sm:$0xff]  ;;  %v263_v43 = vld [vmem:[#allocation8 + $0x60] sm:$0xff] }
  0x9b   :  { %1084 = vmatpush3.bf16.msra.mxu1 %v1083_v18  ;;  %v172_v41 = vld [vmem:[#allocation7 + $0x78] sm:$0xff]  ;;  %v1095_v42 = vpack.c.bf16 %v262_v38, %v261_v37  ;;  %v264_v44 = vld [vmem:[#allocation8 + $0x68] sm:$0xff]  ;;  %v156_v47 = vld [vmem:[#allocation2] sm:$0xff] }
  0x9c   :  { %1085 = vmatprep.subr.bf16.mxu1 %v1476_v0  ;;  %v1077_v45 = vpack.c.bf16 %v172_v41, %v171_v40  ;;  %v1098_v46 = vpack.c.bf16 %v264_v44, %v263_v43  ;;  %v265_v48 = vld [vmem:[#allocation8 + $0x70] sm:$0xff]  ;;  %v266_v49 = vld [vmem:[#allocation8 + $0x78] sm:$0xff]  ;;  %v346_v51 = vld [vmem:[#allocation10 + $0x8] sm:$0xff] }
  0x9d   :  { %1063 = vmatpush3.bf16.msra.mxu0 %v1062_v14  ;;  %v1101_v50 = vpack.c.bf16 %v266_v49, %v265_v48  ;;  %v348_v52 = vld [vmem:[#allocation10 + $0x18] sm:$0xff]  ;;  %v345_v53 = vld [vmem:[#allocation10] sm:$0xff]  ;;  %v347_v55 = vld [vmem:[#allocation10 + $0x10] sm:$0xff] }
  0x9e   :  { %1064 = vmatprep.subr.bf16.mxu0 %v1476_v0  ;;  %v1103_v54 = vpack.c.bf16 %v348_v52, %v346_v51  ;;  %v350_v56 = vld [vmem:[#allocation10 + $0x28] sm:$0xff]  ;;  %v352_v57 = vld [vmem:[#allocation10 + $0x38] sm:$0xff]  ;;  %v1105_v58 = vpack.c.bf16 %v347_v55, %v345_v53  ;;  %v349_v60 = vld [vmem:[#allocation10 + $0x20] sm:$0xff] }
  0x9f   :  { %1087 = vmatpush3.bf16.msra.mxu1 %v1086_v24  ;;  %v1107_v59 = vpack.c.bf16 %v352_v57, %v350_v56  ;;  %v351_v61 = vld [vmem:[#allocation10 + $0x30] sm:$0xff]  ;;  %v354_v62 = vld [vmem:[#allocation10 + $0x48] sm:$0xff]  ;;  %v356_v63 = vld [vmem:[#allocation10 + $0x58] sm:$0xff] }
  0xa0   :  { %1088 = vmatprep.subr.bf16.mxu1 %v1476_v0  ;;  %v1109_v2 = vpack.c.bf16 %v351_v61, %v349_v60  ;;  %v1111_v3 = vpack.c.bf16 %v356_v63, %v354_v62  ;;  %v353_v4 = vld [vmem:[#allocation10 + $0x40] sm:$0xff]  ;;  %v355_v5 = vld [vmem:[#allocation10 + $0x50] sm:$0xff]  ;;  %v358_v6 = vld [vmem:[#allocation10 + $0x68] sm:$0xff] }
  0xa1   :  { %1066 = vmatpush3.bf16.msra.mxu0 %v1065_v21  ;;  %v360_v7 = vld [vmem:[#allocation10 + $0x78] sm:$0xff]  ;;  %v1113_v8 = vpack.c.bf16 %v355_v5, %v353_v4  ;;  %v357_v10 = vld [vmem:[#allocation10 + $0x60] sm:$0xff]  ;;  %v359_v11 = vld [vmem:[#allocation10 + $0x70] sm:$0xff] }
  0xa2   :  { %1067 = vmatprep.subr.bf16.mxu0 %v1476_v0  ;;  %v1115_v9 = vpack.c.bf16 %v360_v7, %v358_v6  ;;  %v362_v12 = vld [vmem:[#allocation10 + $0x88] sm:$0xff]  ;;  %v364_v13 = vld [vmem:[#allocation10 + $0x98] sm:$0xff]  ;;  %v1117_v14 = vpack.c.bf16 %v359_v11, %v357_v10  ;;  %v361_v16 = vld [vmem:[#allocation10 + $0x80] sm:$0xff] }
  0xa3   :  { %1090 = vmatpush3.bf16.msra.mxu1 %v1089_v30  ;;  %v1119_v15 = vpack.c.bf16 %v364_v13, %v362_v12  ;;  %v363_v17 = vld [vmem:[#allocation10 + $0x90] sm:$0xff]  ;;  %v366_v18 = vld [vmem:[#allocation10 + $0xa8] sm:$0xff]  ;;  %v368_v19 = vld [vmem:[#allocation10 + $0xb8] sm:$0xff] }
  0xa4   :  { %1091 = vmatprep.subr.bf16.mxu1 %v1476_v0  ;;  %v1121_v20 = vpack.c.bf16 %v363_v17, %v361_v16  ;;  %v1123_v21 = vpack.c.bf16 %v368_v19, %v366_v18  ;;  %v365_v22 = vld [vmem:[#allocation10 + $0xa0] sm:$0xff]  ;;  %v367_v23 = vld [vmem:[#allocation10 + $0xb0] sm:$0xff]  ;;  %v370_v24 = vld [vmem:[#allocation10 + $0xc8] sm:$0xff] }
  0xa5   :  { %1069 = vmatpush3.bf16.msra.mxu0 %v1068_v27  ;;  %v372_v25 = vld [vmem:[#allocation10 + $0xd8] sm:$0xff]  ;;  %v1125_v26 = vpack.c.bf16 %v367_v23, %v365_v22  ;;  %v369_v28 = vld [vmem:[#allocation10 + $0xc0] sm:$0xff]  ;;  %v371_v29 = vld [vmem:[#allocation10 + $0xd0] sm:$0xff] }
  0xa6   :  { %1070 = vmatprep.subr.bf16.mxu0 %v1476_v0  ;;  %v1127_v27 = vpack.c.bf16 %v372_v25, %v370_v24  ;;  %v1129_v30 = vpack.c.bf16 %v371_v29, %v369_v28  ;;  %v789_v31 = vld [vmem:[%s1775_s3] ss:$0 sm:$0xff]  ;;  %v376_v37 = vld [vmem:[#allocation10 + $0xf8] sm:$0xff]  ;;  %v467_v43 = vld [vmem:[#allocation11 + $0x8] sm:$0xff] }
  0xa7   :  { %1093 = vmatpush3.bf16.msra.mxu1 %v1092_v36  ;;  %v374_v36 = vld [vmem:[#allocation10 + $0xe8] sm:$0xff]  ;;  %v375_v40 = vld [vmem:[#allocation10 + $0xf0] sm:$0xff]  ;;  %v470_v53 = vld [vmem:[#allocation11 + $0x20] sm:$0xff] }
  0xa8   :  { %1094 = vmatprep.subr.bf16.mxu1 %v1476_v0  ;;  %v1131_v38 = vpack.c.bf16 %v376_v37, %v374_v36  ;;  %v468_v44 = vld [vmem:[#allocation11 + $0x10] sm:$0xff]  ;;  %v473_v57 = vld [vmem:[#allocation11 + $0x38] sm:$0xff]  ;;  %v475_v60 = vld [vmem:[#allocation11 + $0x48] sm:$0xff] }
  0xa9   :  { %1072 = vmatpush3.bf16.msra.mxu0 %v1071_v33  ;;  %v790_v48 = vld [vmem:[%s1777_s5] ss:$0 sm:$0xff]  ;;  %v477_v63 = vld [vmem:[#allocation11 + $0x58] sm:$0xff]  ;;  %v479_v4 = vld [vmem:[#allocation11 + $0x68] sm:$0xff] }
  0xaa   :  { %1073 = vmatprep.subr.bf16.mxu0 %v1476_v0  ;;  %v472_v56 = vld [vmem:[#allocation11 + $0x30] sm:$0xff]  ;;  %v481_v7 = vld [vmem:[#allocation11 + $0x78] sm:$0xff]  ;;  %v561_v10 = vld [vmem:[#allocation13 + $0x8] sm:$0xff] }
  0xab   :  { %1096 = vmatpush3.bf16.msra.mxu1 %v1095_v42  ;;  %v466_v42 = vld [vmem:[#allocation11] sm:$0xff]  ;;  %v476_v62 = vld [vmem:[#allocation11 + $0x50] sm:$0xff]  ;;  %v563_v13 = vld [vmem:[#allocation13 + $0x18] sm:$0xff] }
  0xac   :  { %1097 = vmatprep.subr.bf16.mxu1 %v1476_v0  ;;  %v480_v6 = vld [vmem:[#allocation11 + $0x70] sm:$0xff]  ;;  %v565_v16 = vld [vmem:[#allocation13 + $0x28] sm:$0xff]  ;;  %v567_v19 = vld [vmem:[#allocation13 + $0x38] sm:$0xff] }
  0xad   :  { %1075 = vmatpush3.bf16.msra.mxu0 %v1074_v39  ;;  %v373_v39 = vld [vmem:[#allocation10 + $0xe0] sm:$0xff]  ;;  %v562_v11 = vld [vmem:[#allocation13 + $0x10] sm:$0xff]  ;;  %v569_v22 = vld [vmem:[#allocation13 + $0x48] sm:$0xff] }
  0xae   :  { %1076 = vmatprep.subr.bf16.mxu0 %v1476_v0  ;;  %v1133_v41 = vpack.c.bf16 %v375_v40, %v373_v39  ;;  %v566_v18 = vld [vmem:[#allocation13 + $0x30] sm:$0xff]  ;;  %v571_v25 = vld [vmem:[#allocation13 + $0x58] sm:$0xff]  ;;  %v573_v28 = vld [vmem:[#allocation13 + $0x68] sm:$0xff] }
  0xaf   :  { %1099 = vmatpush3.bf16.msra.mxu1 %v1098_v46  ;;  %v469_v46 = vld [vmem:[#allocation11 + $0x18] sm:$0xff]  ;;  %v570_v24 = vld [vmem:[#allocation13 + $0x50] sm:$0xff] }
  0xb0   :  { %1100 = vmatprep.subr.bf16.mxu1 %v1476_v0 }
  0xb1   :  { %1078 = vmatpush3.bf16.msra.mxu0 %v1077_v45  ;;  %v1136_v45 = vpack.c.bf16 %v467_v43, %v466_v42  ;;  %v460_v43 = vld [vmem:[#allocation5] sm:$0xff] }
  0xb2   :  { %1104 = vmatprep.subr.bf16.mxu0 %v1103_v54  ;;  %v471_v54 = vld [vmem:[#allocation11 + $0x28] sm:$0xff] }
  0xb3   :  { %1102 = vmatpush3.bf16.msra.mxu1 %v1101_v50  ;;  %v1142_v55 = vpack.c.bf16 %v471_v54, %v470_v53  ;;  %v657_v54 = vld [vmem:[#allocation14 + $0x18] sm:$0xff] }
  0xb4   :  { %913 = vmatmul.mubr.f32.vlgmr.msra.gmra.mrb[0].mxu0 %v156_v47  ;;  %1135 = vmatprep.subr.bf16.mxu1 %v1476_v0  ;;  %v1139_v47 = vpack.c.bf16 %v469_v46, %v468_v44 }
  0xb5   :  { %453 = vmatprep.mubr.f32.mxu0 %v1478_v1  ;;  %1106 = vmatpush1.bf16.msra.mxu0 %v1105_v58  ;;  %v1145_v58 = vpack.c.bf16 %v473_v57, %v472_v56  ;;  %v658_v56 = vld [vmem:[#allocation14 + $0x20] sm:$0xff]  ;;  %v659_v57 = vld [vmem:[#allocation14 + $0x28] sm:$0xff] }
  0xb6   :  { %1108 = vmatprep.subr.bf16.mxu0 %v1107_v59  ;;  %v474_v59 = vld [vmem:[#allocation11 + $0x40] sm:$0xff] }
  0xb7   :  { %v1148_v61 = vpack.c.bf16 %v475_v60, %v474_v59  ;;  %v661_v59 = vld [vmem:[#allocation14 + $0x38] sm:$0xff] }
  0xb9   :  { %1110 = vmatpush1.bf16.msra.mxu0 %v1109_v2  ;;  %v1151_v2 = vpack.c.bf16 %v477_v63, %v476_v62  ;;  %v663_v62 = vld [vmem:[#allocation14 + $0x48] sm:$0xff] }
  0xba   :  { %1112 = vmatprep.subr.bf16.mxu0 %v1111_v3  ;;  %v478_v3 = vld [vmem:[#allocation11 + $0x60] sm:$0xff] }
  0xbb   :  { %v1154_v5 = vpack.c.bf16 %v479_v4, %v478_v3  ;;  %v665_v3 = vld [vmem:[#allocation14 + $0x58] sm:$0xff] }
  0xbd   :  { %1114 = vmatpush1.bf16.msra.mxu0 %v1113_v8  ;;  %v1157_v8 = vpack.c.bf16 %v481_v7, %v480_v6  ;;  %v667_v6 = vld [vmem:[#allocation14 + $0x68] sm:$0xff] }
  0xbe   :  { %1116 = vmatprep.subr.bf16.mxu0 %v1115_v9  ;;  %v560_v9 = vld [vmem:[#allocation13] sm:$0xff] }
  0xbf   :  { %v1160_v12 = vpack.c.bf16 %v561_v10, %v560_v9 }
  0xc1   :  { %1118 = vmatpush1.bf16.msra.mxu0 %v1117_v14  ;;  %v1163_v14 = vpack.c.bf16 %v563_v13, %v562_v11  ;;  %v668_v13 = vld [vmem:[#allocation14 + $0x70] sm:$0xff] }
  0xc2   :  { %1120 = vmatprep.subr.bf16.mxu0 %v1119_v15  ;;  %v564_v15 = vld [vmem:[#allocation13 + $0x20] sm:$0xff] }
  0xc3   :  { %v1166_v17 = vpack.c.bf16 %v565_v16, %v564_v15  ;;  %v792_v16 = vld [vmem:[%s1783_s11] ss:$0 sm:$0xff] }
  0xc5   :  { %1122 = vmatpush1.bf16.msra.mxu0 %v1121_v20  ;;  %v1169_v20 = vpack.c.bf16 %v567_v19, %v566_v18 }
  0xc6   :  { %1124 = vmatprep.subr.bf16.mxu0 %v1123_v21  ;;  %v568_v21 = vld [vmem:[#allocation13 + $0x40] sm:$0xff] }
  0xc7   :  { %v1172_v23 = vpack.c.bf16 %v569_v22, %v568_v21 }
  0xc9   :  { %1126 = vmatpush1.bf16.msra.mxu0 %v1125_v26  ;;  %v1175_v26 = vpack.c.bf16 %v571_v25, %v570_v24 }
  0xca   :  { %1128 = vmatprep.subr.bf16.mxu0 %v1127_v27  ;;  %v572_v27 = vld [vmem:[#allocation13 + $0x60] sm:$0xff] }
  0xcb   :  { %v1178_v29 = vpack.c.bf16 %v573_v28, %v572_v27 }
  0xcd   :  { %1130 = vmatpush1.bf16.msra.mxu0 %v1129_v30  ;;  %v379_v30 = vlaneseq }
  0xce   :  { %1132 = vmatprep.subr.bf16.mxu0 %v1131_v38 }
  0xd1   :  { %1134 = vmatpush1.bf16.msra.mxu0 %v1133_v41 }
  0xd2   :  { %1159 = vmatprep.subr.bf16.mxu0 %v1476_v0 }
 0x187   :  { %v246_v32 = vpop.f32.mrb[0].mxu0 }
 0x188   :  { %v247_v33 = vadd.f32 %v789_v31, %v246_v32  ;;  %v914_v34 = vpop.f32.mrb[1].mxu0  ;;  %v380_v31 = vshrl.u32 %v379_v30, 7 }
 0x18a   :  { %v250_v35 = vmax.f32 %v247_v33, 0.0  ;;  %v381_v32 = vsub.s32 0, %v380_v31  ;;  %v377_v33 = vld [vmem:[%s1779_s7] sm:$0x3]  ;;  %v385_v34 = vsub.s32 1, %v380_v31 }
 0x18c   :  { %948 = vmatmul.mubr.f32.vlgmr.msra.gmra.mrb[0].mxu1 %v250_v35  ;;  %v382_v35 = vrot.slane %v377_v33, %v381_v32  ;;  %v386_v36 = vrot.slane %v377_v33, %v385_v34 }
 0x18d   :  { %982 = vmatprep.mubr.msk.f32.mxu1 %vm1477_vm0, %v1478_v1  ;;  %1137 = vmatpush3.bf16.msra.mxu1 %v1136_v45 }
 0x18e   :  { %1138 = vmatprep.subr.bf16.mxu1 %v1476_v0 }
 0x191   :  { %1140 = vmatpush3.bf16.msra.mxu1 %v1139_v47  ;;  %v574_v47 = vld [vmem:[#allocation13 + $0x70] sm:$0xff] }
 0x192   :  { %1141 = vmatprep.subr.bf16.mxu1 %v1476_v0 }
 0x195   :  { %1143 = vmatpush3.bf16.msra.mxu1 %v1142_v55 }
 0x196   :  { %1144 = vmatprep.subr.bf16.mxu1 %v1476_v0 }
 0x199   :  { %1146 = vmatpush3.bf16.msra.mxu1 %v1145_v58  ;;  %v1190_v58 = vpack.c.bf16 %v659_v57, %v658_v56 }
 0x19a   :  { %1147 = vmatprep.subr.bf16.mxu1 %v1476_v0 }
 0x19d   :  { %1149 = vmatpush3.bf16.msra.mxu1 %v1148_v61  ;;  %v662_v61 = vld [vmem:[#allocation14 + $0x40] sm:$0xff] }
 0x19e   :  { %1150 = vmatprep.subr.bf16.mxu1 %v1476_v0  ;;  %v1196_v63 = vpack.c.bf16 %v663_v62, %v662_v61 }
 0x1a1   :  { %1152 = vmatpush3.bf16.msra.mxu1 %v1151_v2  ;;  %v664_v2 = vld [vmem:[#allocation14 + $0x50] sm:$0xff] }
 0x1a2   :  { %1153 = vmatprep.subr.bf16.mxu1 %v1476_v0  ;;  %v1199_v4 = vpack.c.bf16 %v665_v3, %v664_v2 }
 0x1a5   :  { %1155 = vmatpush3.bf16.msra.mxu1 %v1154_v5  ;;  %v666_v5 = vld [vmem:[#allocation14 + $0x60] sm:$0xff] }
 0x1a6   :  { %1156 = vmatprep.subr.bf16.mxu1 %v1476_v0  ;;  %v1202_v7 = vpack.c.bf16 %v667_v6, %v666_v5 }
 0x1a9   :  { %1158 = vmatpush3.bf16.msra.mxu1 %v1157_v8  ;;  %v791_v8 = vld [vmem:[%s1781_s9] ss:$0 sm:$0xff]  ;;  %s772_s9 = sshll.u32 %s1479_s25, 4  ;;  %s773_s9 = int_to_ptr.vmem [resolvable:$true] %s772_s9 }
 0x1aa   :  { %1183 = vmatprep.subr.bf16.mxu1 %v1476_v0  ;;  %s1406_s4 = scalar_lea.vmem %s773_s9, 256  ;;  %p1411_p9 = scmp.lt.s32.totalorder %s773_s9, %s773_s9 }
 0x1ab   :  { %p1407_p8 = scmp.ne.s32.totalorder %s773_s9, %s1406_s4  ;;  %p1412_p10 = scmp.lt.s32.totalorder %s1406_s4, %s1406_s4 }
 0x1ad   :  { %p1413_p11 = por %p1412_p10, %p1411_p9 }
 0x1af   :  { %p1414_p12 = pnand %p1413_p11, %p1407_p8 }
 0x25f   :  { %v340_v49 = vpop.f32.mrb[0].mxu1 }
 0x260   :  { %v341_v50 = vadd.f32 %v790_v48, %v340_v49  ;;  %v949_v51 = vpop.f32.mrb[1].mxu1  ;;  %v575_v48 = vld [vmem:[#allocation13 + $0x78] sm:$0xff] }
 0x261   :  { %v1181_v49 = vpack.c.bf16 %v575_v48, %v574_v47  ;;  %v655_v51 = vld [vmem:[#allocation14 + $0x8] sm:$0xff] }
 0x262   :  { %v344_v52 = vmax.f32 %v341_v50, 0.0  ;;  %v654_v50 = vld [vmem:[#allocation14] sm:$0xff] }
 0x263   :  { %v1184_v53 = vpack.c.bf16 %v655_v51, %v654_v50 }
 0x264   :  { %454 = vmatmul.mubr.f32.vlgmr.msra.gmra.mrb[2].mxu0 %v344_v52  ;;  %v656_v52 = vld [vmem:[#allocation14 + $0x10] sm:$0xff] }
 0x265   :  { %1017 = vmatprep.mubr.msk.f32.mxu0 %vm1477_vm0, %v1478_v1  ;;  %1161 = vmatpush3.bf16.msra.mxu0 %v1160_v12  ;;  %v1187_v55 = vpack.c.bf16 %v657_v54, %v656_v52 }
 0x266   :  { %1162 = vmatprep.subr.bf16.mxu0 %v1476_v0 }
 0x269   :  { %1164 = vmatpush3.bf16.msra.mxu0 %v1163_v14  ;;  %v669_v14 = vld [vmem:[#allocation14 + $0x78] sm:$0xff] }
 0x26a   :  { %1165 = vmatprep.subr.bf16.mxu0 %v1476_v0  ;;  %v1205_v15 = vpack.c.bf16 %v669_v14, %v668_v13 }
 0x26d   :  { %1167 = vmatpush3.bf16.msra.mxu0 %v1166_v17 }
 0x26e   :  { %1168 = vmatprep.subr.bf16.mxu0 %v1476_v0 }
 0x271   :  { %1170 = vmatpush3.bf16.msra.mxu0 %v1169_v20 }
 0x272   :  { %1171 = vmatprep.subr.bf16.mxu0 %v1476_v0 }
 0x275   :  { %1173 = vmatpush3.bf16.msra.mxu0 %v1172_v23 }
 0x276   :  { %1174 = vmatprep.subr.bf16.mxu0 %v1476_v0 }
 0x279   :  { %1176 = vmatpush3.bf16.msra.mxu0 %v1175_v26 }
 0x27a   :  { %1177 = vmatprep.subr.bf16.mxu0 %v1476_v0 }
 0x27d   :  { %1179 = vmatpush3.bf16.msra.mxu0 %v1178_v29 }
 0x27e   :  { %1180 = vmatprep.subr.bf16.mxu0 %v1476_v0 }
 0x281   :  { %1182 = vmatpush3.bf16.msra.mxu0 %v1181_v49 }
 0x337   :  { %v455_v37 = vpop.f32.mrb[2].mxu0 }
 0x338   :  { %v456_v38 = vadd.f32 %v455_v37, %v382_v35  ;;  %v457_v39 = vpop.f32.mrb[3].mxu0 }
 0x339   :  { %v458_v40 = vadd.f32 %v457_v39, %v386_v36 }
 0x33a   :  { %754 = vst [vmem:[#allocation17] sm:$0xff] %v456_v38 }
 0x33b   :  { %v461_v41 = vmul.f32 0.5, %v458_v40  ;;  %755 = vst [vmem:[#allocation17 + $0x8] sm:$0xff] %v458_v40 }
 0x33d   :  { %v462_v42 = vmul.f32 1.442695, %v461_v41 }
 0x33f   :  { %1224 = vpow2.f32 %v462_v42 }
 0x349   :  { %v1225_v44 = vpop.eup %1224 }
 0x34a   :  { %v464_v45 = vmul.f32 %v1225_v44, %v460_v43 }
 0x34c   :  { %v465_v46 = vadd.f32 %v464_v45, %v456_v38 }
 0x34e   :  { %983 = vmatmul.mubr.f32.vlgmr.msra.gmra.mrb[2].mxu1 %v465_v46 }
 0x34f   :  { %1052 = vmatprep.mubr.msk.f32.mxu1 %vm1477_vm0, %v1478_v1  ;;  %1185 = vmatpush3.bf16.msra.mxu1 %v1184_v53  ;;  %v660_v1 = vld [vmem:[#allocation14 + $0x30] sm:$0xff] }
 0x350   :  { %1186 = vmatprep.subr.bf16.mxu1 %v1476_v0  ;;  %v1193_v60 = vpack.c.bf16 %v661_v59, %v660_v1 }
 0x353   :  { %1188 = vmatpush3.bf16.msra.mxu1 %v1187_v55 }
 0x354   :  { %1189 = vmatprep.subr.bf16.mxu1 %v1476_v0 }
 0x357   :  { %1191 = vmatpush3.bf16.msra.mxu1 %v1190_v58 }
 0x358   :  { %1192 = vmatprep.subr.bf16.mxu1 %v1476_v0 }
 0x35b   :  { %1194 = vmatpush3.bf16.msra.mxu1 %v1193_v60 }
 0x35c   :  { %1195 = vmatprep.subr.bf16.mxu1 %v1476_v0 }
 0x35f   :  { %1197 = vmatpush3.bf16.msra.mxu1 %v1196_v63 }
 0x360   :  { %1198 = vmatprep.subr.bf16.mxu1 %v1476_v0 }
 0x363   :  { %1200 = vmatpush3.bf16.msra.mxu1 %v1199_v4 }
 0x364   :  { %1201 = vmatprep.subr.bf16.mxu1 %v1476_v0 }
 0x367   :  { %1203 = vmatpush3.bf16.msra.mxu1 %v1202_v7 }
 0x368   :  { %1204 = vmatprep.subr.bf16.mxu1 %v1476_v0 }
 0x36b   :  { %1206 = vmatpush3.bf16.msra.mxu1 %v1205_v15 }
 0x421   :  { %v555_v9 = vpop.f32.mrb[2].mxu1 }
 0x422   :  { %v556_v10 = vadd.f32 %v791_v8, %v555_v9  ;;  %v984_v11 = vpop.f32.mrb[3].mxu1 }
 0x424   :  { %v559_v12 = vmax.f32 %v556_v10, 0.0 }
 0x426   :  { %1018 = vmatmul.mubr.f32.vlgmr.msra.gmra.mrb[4].mxu0 %v559_v12 }
 0x4f9   :  { %v649_v17 = vpop.f32.mrb[4].mxu0 }
 0x4fa   :  { %v650_v18 = vadd.f32 %v792_v16, %v649_v17  ;;  %v1019_v0 = vpop.f32.mrb[5].mxu0 }
 0x4fc   :  { %v653_v19 = vmax.f32 %v650_v18, 0.0 }
 0x4fe   :  { %1053 = vmatmul.mubr.f32.vlgmr.msra.gmra.mrb[4].mxu1 %v653_v19 }
 0x4ff   :  { %1417 = shalt.err (!%p1414_p12)
}
 0x500   :  { %s1418_s23 = scalar_lea.hbm %s1787_s15, 256 }
 0x501   :  { %p1419_p13 = scmp.ne.s32.totalorder %s1787_s15, %s1418_s23  ;;  %p1422_p0 = scmp.lt.u32.totalorder %s1418_s23, %s1787_s15 }
 0x503   :  { %p1424_p1 = pnand %p1422_p0, %p1419_p13 }
 0x505   :  { %1427 = shalt.err (!%p1424_p1)
}
 0x506   :  { %775 = dma.vmem_to_hbm [thread:$0]  %s773_s9, 256, %s1787_s15, [#allocation18]   ;;  %v793_v20 = vld [vmem:[%s1785_s13] ss:$0 sm:$0xff] }
 0x507   :  { %s1480_s0 = smov [#allocation16]  }
 0x508   :  { %s762_s22 = sshll.u32 %s1480_s0, 4  ;;  %s763_s22 = int_to_ptr.vmem [resolvable:$true] %s762_s22 }
 0x509   :  { %s1428_s10 = scalar_lea.vmem %s763_s22, 128  ;;  %p1433_p3 = scmp.lt.s32.totalorder %s763_s22, %s763_s22 }
 0x50a   :  { %p1429_p2 = scmp.ne.s32.totalorder %s763_s22, %s1428_s10  ;;  %p1434_p4 = scmp.lt.s32.totalorder %s1428_s10, %s1428_s10 }
 0x50c   :  { %p1435_p5 = por %p1434_p4, %p1433_p3 }
 0x50e   :  { %p1436_p6 = pnand %p1435_p5, %p1429_p2 }
 0x5d1   :  { %v743_v21 = vpop.f32.mrb[4].mxu1 }
 0x5d2   :  { %v744_v22 = vadd.f32 %v793_v20, %v743_v21  ;;  %v1054_v23 = vpop.f32.mrb[5].mxu1 }
 0x5d4   :  { %v794_v24 = vmul.f32 -1.442695, %v744_v22 }
 0x5d6   :  { %1226 = vpow2.f32 %v794_v24 }
 0x5e0   :  { %v1227_v25 = vpop.eup %1226 }
 0x5e1   :  { %v750_v26 = vadd.f32 1.0, %v1227_v25 }
 0x5e3   :  { %1228 = vrcp.f32 %v750_v26 }
 0x5ed   :  { %v1229_v27 = vpop.eup %1228 }
 0x5ee   :  { %753 = vst [vmem:[#allocation16] sm:$0xff] %v1229_v27 }
 0x5ef   :  { %1439 = shalt.err (!%p1436_p6)
}
 0x5f0   :  { %s1440_s21 = scalar_lea.hbm %s1786_s14, 128 }
 0x5f1   :  { %p1441_p7 = scmp.ne.s32.totalorder %s1786_s14, %s1440_s21  ;;  %p1444_p8 = scmp.lt.u32.totalorder %s1440_s21, %s1786_s14 }
 0x5f3   :  { %p1446_p9 = pnand %p1444_p8, %p1441_p7 }
 0x5f5   :  { %1449 = shalt.err (!%p1446_p9)
}
 0x5f6   :  { %765 = dma.vmem_to_hbm [thread:$0]  %s763_s22, 128, %s1786_s14, [#allocation4]  }
 0x5f7   :  { %1460 = dma.done.wait [#allocation4], 128  }
 0x5f8   :  { %1461 = vsyncadd [#allocation4], 4294967168 }
 0x5f9   :  { %1462 = dma.done.wait [#allocation18], 256  }
 0x5fa   :  { %1463 = vsyncadd [#allocation18], 4294967040 }
 0x5fb   :  { %782 = vsyncpa [#allocation3], 1 }
 0x5fc   :  { %783 = vsyncpa [#allocation6], 1 }
 0x5fd   :  { %784 = vsyncpa [#allocation9], 1 }
 0x5fe   :  { %785 = vsyncpa [#allocation12], 1 }
 0x5ff   :  { %786 = vsyncpa [#allocation15], 1 }
 0x600   :  { %787 = vsyncpa [#allocation4], 1 }
 0x601   :  { %788 = vsyncpa [#allocation18], 1 }

</bundles_post_ra>
